<compile_context>
chip_gen: v5e
topology: v5e:2x2
jax: 0.10.0
libtpu: 0.0.40
codegen_flags: <defaults>
</compile_context>

<pallas_src>
import jax
import jax.numpy as jnp
from jax import lax
from jax.experimental import pallas as pl
from jax.experimental.pallas import tpu as pltpu

NEG_INF = -1e9
TILE_M = 256


# ----------------------------- kernel helpers ------------------------------

def _gat_heads(xs, xd, w_ref, asrc_ref, adst_ref, mask):
    """Fused multi-head GAT attention over a dense-masked graph.

    xs:       (N,  F)  inputs for all source nodes
    xd:       (Tm, F)  inputs for this tile's destination nodes
    w_ref:    (H, F, C) per-head projection weights (VMEM ref)
    asrc_ref: (H, 1, C) per-head attention vector (source side)
    adst_ref: (H, 1, C) per-head attention vector (target side)
    mask:     (Tm, N)  additive edge mask: 0 where edge j->i exists, -1e9 else
    returns   (Tm, H*C) per-head aggregations concatenated along lanes.
    """
    num_heads = w_ref.shape[0]
    outs = []
    for h in range(num_heads):                     # static unroll over heads
        w = w_ref[h]                                                 # (F, C)
        xp_s = jnp.dot(xs, w, preferred_element_type=jnp.float32)    # (N, C)
        xp_d = jnp.dot(xd, w, preferred_element_type=jnp.float32)    # (Tm, C)
        # Per-node attention scores; source scores land on the lane axis.
        s_src = lax.dot_general(asrc_ref[h], xp_s, (((1,), (1,)), ((), ())),
                                preferred_element_type=jnp.float32)  # (1, N)
        s_dst = lax.dot_general(xp_d, adst_ref[h], (((1,), (1,)), ((), ())),
                                preferred_element_type=jnp.float32)  # (Tm, 1)
        e = s_dst + s_src                      # e[i, j] = <adst,x_i>+<asrc,x_j>
        e = jnp.where(e >= 0, e, 0.2 * e)      # LeakyReLU(negative_slope=0.2)
        e = e + mask                           # -1e9 where edge j->i missing
        m = jnp.max(e, axis=-1, keepdims=True)
        p = jnp.exp(e - m)
        alpha = p / jnp.sum(p, axis=-1, keepdims=True)   # softmax over sources
        outs.append(jnp.dot(alpha, xp_s,
                            preferred_element_type=jnp.float32))     # (Tm, C)
    return jnp.concatenate(outs, axis=-1)                            # (Tm, H*C)


def _gat1_relu_kernel(xs_ref, xd_ref, w_ref, asrc_ref, adst_ref, bias_ref,
                      mask_ref, o_ref):
    y = _gat_heads(xs_ref[...], xd_ref[...], w_ref, asrc_ref, adst_ref,
                   mask_ref[...])
    o_ref[...] = jnp.maximum(y + bias_ref[...], 0.0)


def _gatN_res_relu_kernel(xs_ref, xd_ref, x0_ref, w_ref, asrc_ref, adst_ref,
                          bias_ref, fcw_ref, fcb_ref, mask_ref, o_ref):
    y = _gat_heads(xs_ref[...], xd_ref[...], w_ref, asrc_ref, adst_ref,
                   mask_ref[...])
    res = jnp.dot(x0_ref[...], fcw_ref[...],
                  preferred_element_type=jnp.float32) + fcb_ref[...]
    o_ref[...] = jnp.maximum(y + bias_ref[...] + res, 0.0)


# ------------------------------ pallas wrappers -----------------------------

def gat_layer_relu(x, w, a_src, a_dst, bias, mask_bias, tile_m=TILE_M):
    """relu(GATConv(x)) fused into one kernel.  x: (N, F), w: (H, F, C)."""
    n, f = x.shape
    h, _, c = w.shape
    tm = min(tile_m, n)
    return pl.pallas_call(
        _gat1_relu_kernel,
        out_shape=jax.ShapeDtypeStruct((n, h * c), jnp.float32),
        grid_spec=pltpu.PrefetchScalarGridSpec(
            num_scalar_prefetch=0,
            grid=(pl.cdiv(n, tm),),
            in_specs=[
                pl.BlockSpec((n, f), lambda i: (0, 0)),        # all sources
                pl.BlockSpec((tm, f), lambda i: (i, 0)),       # dst rows
                pl.BlockSpec((h, f, c), lambda i: (0, 0, 0)),  # weights
                pl.BlockSpec((h, 1, c), lambda i: (0, 0, 0)),  # att_src
                pl.BlockSpec((h, 1, c), lambda i: (0, 0, 0)),  # att_dst
                pl.BlockSpec((1, h * c), lambda i: (0, 0)),    # conv bias
                pl.BlockSpec((tm, n), lambda i: (i, 0)),       # mask rows
            ],
            out_specs=pl.BlockSpec((tm, h * c), lambda i: (i, 0))),
        compiler_params=pltpu.CompilerParams(
            dimension_semantics=("parallel",)),
    )(x.astype(jnp.float32), x.astype(jnp.float32), w.astype(jnp.float32),
      a_src.reshape(h, 1, c).astype(jnp.float32),
      a_dst.reshape(h, 1, c).astype(jnp.float32),
      bias.reshape(1, h * c).astype(jnp.float32),
      mask_bias.astype(jnp.float32))


def gat_layer_residual_relu(x, x0, w, a_src, a_dst, bias, fc_w, fc_b,
                            mask_bias, tile_m=TILE_M):
    """relu(GATConv(x) + fc(x0)) fused into one kernel."""
    n, f = x.shape
    _, f0 = x0.shape
    h, _, c = w.shape
    tm = min(tile_m, n)
    return pl.pallas_call(
        _gatN_res_relu_kernel,
        out_shape=jax.ShapeDtypeStruct((n, h * c), jnp.float32),
        grid_spec=pltpu.PrefetchScalarGridSpec(
            num_scalar_prefetch=0,
            grid=(pl.cdiv(n, tm),),
            in_specs=[
                pl.BlockSpec((n, f), lambda i: (0, 0)),        # all sources
                pl.BlockSpec((tm, f), lambda i: (i, 0)),       # dst rows
                pl.BlockSpec((tm, f0), lambda i: (i, 0)),      # original x rows
                pl.BlockSpec((h, f, c), lambda i: (0, 0, 0)),  # weights
                pl.BlockSpec((h, 1, c), lambda i: (0, 0, 0)),  # att_src
                pl.BlockSpec((h, 1, c), lambda i: (0, 0, 0)),  # att_dst
                pl.BlockSpec((1, h * c), lambda i: (0, 0)),    # conv bias
                pl.BlockSpec((f0, h * c), lambda i: (0, 0)),   # fc weight
                pl.BlockSpec((1, h * c), lambda i: (0, 0)),    # fc bias
                pl.BlockSpec((tm, n), lambda i: (i, 0)),       # mask rows
            ],
            out_specs=pl.BlockSpec((tm, h * c), lambda i: (i, 0))),
        compiler_params=pltpu.CompilerParams(
            dimension_semantics=("parallel",)),
    )(x.astype(jnp.float32), x.astype(jnp.float32), x0.astype(jnp.float32),
      w.astype(jnp.float32),
      a_src.reshape(h, 1, c).astype(jnp.float32),
      a_dst.reshape(h, 1, c).astype(jnp.float32),
      bias.reshape(1, h * c).astype(jnp.float32),
      fc_w.astype(jnp.float32),
      fc_b.reshape(1, h * c).astype(jnp.float32),
      mask_bias.astype(jnp.float32))


# ------------------------------- glue (JAX) --------------------------------

def build_mask_bias(edge_index, num_nodes):
    """Dense additive attention mask: 0 where an edge src->dst exists
    (messages aggregate at dst), -1e9 elsewhere.  Self-loops are added to
    match PyG GATConv's default add_self_loops=True."""
    src, dst = edge_index[0], edge_index[1]
    adj = jnp.zeros((num_nodes, num_nodes), jnp.bool_)
    adj = adj.at[dst, src].set(True)
    adj = adj | jnp.eye(num_nodes, dtype=jnp.bool_)
    return jnp.where(adj, 0.0, NEG_INF).astype(jnp.float32)


def multigat_forward(params, x, mask_bias):
    # x = relu(conv1(x, edge_index))   -- one fused kernel
    x1 = gat_layer_relu(x, params["conv1_w"], params["conv1_asrc"],
                        params["conv1_adst"], params["conv1_bias"], mask_bias)
    # x = convN(x, edge_index); res = fc(x0); out = relu(x + res)
    # -- one fused kernel (attention + bias + fc residual + relu)
    # TODO(synk): GATConv attention dropout (p=0.2) is train-only stochastic;
    # eval-mode (identity) forward is implemented here.
    return gat_layer_residual_relu(x1, x, params["convN_w"],
                                   params["convN_asrc"], params["convN_adst"],
                                   params["convN_bias"], params["fc_w"],
                                   params["fc_b"], mask_bias)


def init_params(key, in_ch, hidden, out_ch, heads):
    ks = jax.random.split(key, 10)

    def w(k, shape, scale=0.1):
        return (scale * jax.random.normal(k, shape)).astype(jnp.float32)

    return {
        # GATConv lin weights stored per-head as (H, K, C) == torch weight
        # reshaped to (H, C, K) and transposed; fc weight stored as (K, N).
        "conv1_w": w(ks[0], (heads, in_ch, hidden)),
        "conv1_asrc": w(ks[1], (heads, hidden)),
        "conv1_adst": w(ks[2], (heads, hidden)),
        "conv1_bias": w(ks[3], (heads * hidden,)),
        "convN_w": w(ks[4], (heads, heads * hidden, out_ch)),
        "convN_asrc": w(ks[5], (heads, out_ch)),
        "convN_adst": w(ks[6], (heads, out_ch)),
        "convN_bias": w(ks[7], (heads * out_ch,)),
        "fc_w": w(ks[8], (in_ch, heads * out_ch)),
        "fc_b": w(ks[9], (heads * out_ch,)),
    }


if __name__ == "__main__":
    # Small shapes: 8 nodes, in=16, hidden=32, out=32, heads=4
    # -> concatenated widths H*C = 128 (lane-dense outputs).
    num_nodes, in_channels, hidden, out_channels, heads = 8, 16, 32, 32, 4

    key = jax.random.PRNGKey(0)
    kp, kx, ke1, ke2 = jax.random.split(key, 4)
    params = init_params(kp, in_channels, hidden, out_channels, heads)
    x = jax.random.normal(kx, (num_nodes, in_channels), jnp.float32)

    # Deterministic small graph: a directed ring plus 8 random edges.
    ring_src = jnp.arange(num_nodes, dtype=jnp.int32)
    ring_dst = (ring_src + 1) % num_nodes
    rand_src = jax.random.randint(ke1, (8,), 0, num_nodes, dtype=jnp.int32)
    rand_dst = jax.random.randint(ke2, (8,), 0, num_nodes, dtype=jnp.int32)
    edge_index = jnp.stack([jnp.concatenate([ring_src, rand_src]),
                            jnp.concatenate([ring_dst, rand_dst])])
    mask_bias = build_mask_bias(edge_index, num_nodes)

    fwd = jax.jit(multigat_forward)
    out = fwd(params, x, mask_bias)
    out = jax.block_until_ready(out)

    assert out.shape == (num_nodes, heads * out_channels), out.shape
    assert bool(jnp.all(jnp.isfinite(out)))
    print("KERNEL_OK")
</pallas_src>

<mosaic_0001>
module attributes {stable_mosaic.version = 11 : i64} {
  func.func @_gat1_relu_kernel(%arg0: i32, %arg1: memref<8x16xf32, #tpu.memory_space<vmem>>, %arg2: memref<8x16xf32, #tpu.memory_space<vmem>>, %arg3: memref<4x16x32xf32, #tpu.memory_space<vmem>>, %arg4: memref<4x1x32xf32, #tpu.memory_space<vmem>>, %arg5: memref<4x1x32xf32, #tpu.memory_space<vmem>>, %arg6: memref<1x128xf32, #tpu.memory_space<vmem>>, %arg7: memref<8x8xf32, #tpu.memory_space<vmem>>, %arg8: memref<8x128xf32, #tpu.memory_space<vmem>>) attributes {dimension_semantics = [#tpu.dimension_semantics<parallel>], iteration_bounds = array<i64: 1>, scalar_prefetch = 0 : i64, scratch_operands = 0 : i64, tpu.core_type = #tpu.core_type<tc>, window_params = [{pipeline_mode = #tpu.pipeline_mode<synchronous>, transform_indices = @transform_0, window_bounds = array<i64: 8, 16>}, {transform_indices = @transform_1, window_bounds = array<i64: 8, 16>}, {pipeline_mode = #tpu.pipeline_mode<synchronous>, transform_indices = @transform_2, window_bounds = array<i64: 4, 16, 32>}, {pipeline_mode = #tpu.pipeline_mode<synchronous>, transform_indices = @transform_3, window_bounds = array<i64: 4, 1, 32>}, {pipeline_mode = #tpu.pipeline_mode<synchronous>, transform_indices = @transform_4, window_bounds = array<i64: 4, 1, 32>}, {pipeline_mode = #tpu.pipeline_mode<synchronous>, transform_indices = @transform_5, window_bounds = array<i64: 1, 128>}, {transform_indices = @transform_6, window_bounds = array<i64: 8, 8>}, {transform_indices = @transform_7, window_bounds = array<i64: 8, 128>}]} {
    %c0 = arith.constant 0 : index
    %c0_0 = arith.constant 0 : index
    %0 = vector.load %arg1[%c0, %c0_0] : memref<8x16xf32, #tpu.memory_space<vmem>>, vector<8x16xf32>
    %c0_1 = arith.constant 0 : index
    %c0_2 = arith.constant 0 : index
    %1 = vector.load %arg2[%c0_1, %c0_2] : memref<8x16xf32, #tpu.memory_space<vmem>>, vector<8x16xf32>
    %c0_3 = arith.constant 0 : index
    %c0_4 = arith.constant 0 : index
    %2 = vector.load %arg7[%c0_3, %c0_4] : memref<8x8xf32, #tpu.memory_space<vmem>>, vector<8x8xf32>
    %c0_5 = arith.constant 0 : index
    %c0_6 = arith.constant 0 : index
    %c0_7 = arith.constant 0 : index
    %3 = vector.load %arg3[%c0_5, %c0_6, %c0_7] : memref<4x16x32xf32, #tpu.memory_space<vmem>>, vector<1x16x32xf32>
    %4 = vector.shape_cast %3 : vector<1x16x32xf32> to vector<16x32xf32>
    %cst = arith.constant dense<0.000000e+00> : vector<8x32xf32>
    %5 = tpu.matmul %0, %4, %cst {dimension_numbers = #tpu.dot_dimension_numbers<[1], [0], [0], [1], [0, 0, 1, 1], [], []>} : vector<8x16xf32>, vector<16x32xf32>, vector<8x32xf32> -> vector<8x32xf32>
    %cst_8 = arith.constant dense<0.000000e+00> : vector<8x32xf32>
    %6 = tpu.matmul %1, %4, %cst_8 {dimension_numbers = #tpu.dot_dimension_numbers<[1], [0], [0], [1], [0, 0, 1, 1], [], []>} : vector<8x16xf32>, vector<16x32xf32>, vector<8x32xf32> -> vector<8x32xf32>
    %c0_9 = arith.constant 0 : index
    %c0_10 = arith.constant 0 : index
    %c0_11 = arith.constant 0 : index
    %7 = vector.load %arg4[%c0_9, %c0_10, %c0_11] : memref<4x1x32xf32, #tpu.memory_space<vmem>>, vector<1x1x32xf32>
    %8 = vector.shape_cast %7 : vector<1x1x32xf32> to vector<1x32xf32>
    %cst_12 = arith.constant dense<0.000000e+00> : vector<1x8xf32>
    %9 = tpu.matmul %8, %5, %cst_12 {dimension_numbers = #tpu.dot_dimension_numbers<[1], [1], [0], [0], [0, 0, 1, 0], [], []>} : vector<1x32xf32>, vector<8x32xf32>, vector<1x8xf32> -> vector<1x8xf32>
    %c0_13 = arith.constant 0 : index
    %c0_14 = arith.constant 0 : index
    %c0_15 = arith.constant 0 : index
    %10 = vector.load %arg5[%c0_13, %c0_14, %c0_15] : memref<4x1x32xf32, #tpu.memory_space<vmem>>, vector<1x1x32xf32>
    %11 = vector.shape_cast %10 : vector<1x1x32xf32> to vector<1x32xf32>
    %cst_16 = arith.constant dense<0.000000e+00> : vector<8x1xf32>
    %12 = tpu.matmul %6, %11, %cst_16 {dimension_numbers = #tpu.dot_dimension_numbers<[1], [1], [0], [0], [0, 0, 1, 0], [], []>} : vector<8x32xf32>, vector<1x32xf32>, vector<8x1xf32> -> vector<8x1xf32>
    %13 = vector.broadcast %12 : vector<8x1xf32> to vector<8x8xf32>
    %14 = vector.broadcast %9 : vector<1x8xf32> to vector<8x8xf32>
    %15 = arith.addf %13, %14 : vector<8x8xf32>
    %cst_17 = arith.constant 0.000000e+00 : f32
    %16 = vector.broadcast %cst_17 : f32 to vector<8x8xf32>
    %17 = arith.cmpf oge, %15, %16 : vector<8x8xf32>
    %cst_18 = arith.constant 2.000000e-01 : f32
    %18 = vector.broadcast %cst_18 : f32 to vector<8x8xf32>
    %19 = arith.mulf %18, %15 : vector<8x8xf32>
    %20 = arith.select %17, %15, %19 : vector<8x8xi1>, vector<8x8xf32>
    %21 = arith.addf %20, %2 : vector<8x8xf32>
    %cst_19 = arith.constant dense<0xFF800000> : vector<8xf32>
    %22 = vector.multi_reduction <maximumf>, %21, %cst_19 [1] : vector<8x8xf32> to vector<8xf32>
    %23 = vector.shape_cast %22 : vector<8xf32> to vector<8x1xf32>
    %24 = vector.broadcast %23 : vector<8x1xf32> to vector<8x8xf32>
    %25 = arith.subf %21, %24 : vector<8x8xf32>
    %26 = math.exp %25 : vector<8x8xf32>
    %cst_20 = arith.constant dense<0.000000e+00> : vector<8xf32>
    %27 = vector.multi_reduction <add>, %26, %cst_20 [1] : vector<8x8xf32> to vector<8xf32>
    %28 = vector.shape_cast %27 : vector<8xf32> to vector<8x1xf32>
    %29 = vector.broadcast %28 : vector<8x1xf32> to vector<8x8xf32>
    %30 = arith.divf %26, %29 : vector<8x8xf32>
    %cst_21 = arith.constant dense<0.000000e+00> : vector<8x32xf32>
    %31 = tpu.matmul %30, %5, %cst_21 {dimension_numbers = #tpu.dot_dimension_numbers<[1], [0], [0], [1], [0, 0, 1, 1], [], []>} : vector<8x8xf32>, vector<8x32xf32>, vector<8x32xf32> -> vector<8x32xf32>
    %c1 = arith.constant 1 : index
    %c0_22 = arith.constant 0 : index
    %c0_23 = arith.constant 0 : index
    %32 = vector.load %arg3[%c1, %c0_22, %c0_23] : memref<4x16x32xf32, #tpu.memory_space<vmem>>, vector<1x16x32xf32>
    %33 = vector.shape_cast %32 : vector<1x16x32xf32> to vector<16x32xf32>
    %cst_24 = arith.constant dense<0.000000e+00> : vector<8x32xf32>
    %34 = tpu.matmul %0, %33, %cst_24 {dimension_numbers = #tpu.dot_dimension_numbers<[1], [0], [0], [1], [0, 0, 1, 1], [], []>} : vector<8x16xf32>, vector<16x32xf32>, vector<8x32xf32> -> vector<8x32xf32>
    %cst_25 = arith.constant dense<0.000000e+00> : vector<8x32xf32>
    %35 = tpu.matmul %1, %33, %cst_25 {dimension_numbers = #tpu.dot_dimension_numbers<[1], [0], [0], [1], [0, 0, 1, 1], [], []>} : vector<8x16xf32>, vector<16x32xf32>, vector<8x32xf32> -> vector<8x32xf32>
    %c1_26 = arith.constant 1 : index
    %c0_27 = arith.constant 0 : index
    %c0_28 = arith.constant 0 : index
    %36 = vector.load %arg4[%c1_26, %c0_27, %c0_28] : memref<4x1x32xf32, #tpu.memory_space<vmem>>, vector<1x1x32xf32>
    %37 = vector.shape_cast %36 : vector<1x1x32xf32> to vector<1x32xf32>
    %cst_29 = arith.constant dense<0.000000e+00> : vector<1x8xf32>
    %38 = tpu.matmul %37, %34, %cst_29 {dimension_numbers = #tpu.dot_dimension_numbers<[1], [1], [0], [0], [0, 0, 1, 0], [], []>} : vector<1x32xf32>, vector<8x32xf32>, vector<1x8xf32> -> vector<1x8xf32>
    %c1_30 = arith.constant 1 : index
    %c0_31 = arith.constant 0 : index
    %c0_32 = arith.constant 0 : index
    %39 = vector.load %arg5[%c1_30, %c0_31, %c0_32] : memref<4x1x32xf32, #tpu.memory_space<vmem>>, vector<1x1x32xf32>
    %40 = vector.shape_cast %39 : vector<1x1x32xf32> to vector<1x32xf32>
    %cst_33 = arith.constant dense<0.000000e+00> : vector<8x1xf32>
    %41 = tpu.matmul %35, %40, %cst_33 {dimension_numbers = #tpu.dot_dimension_numbers<[1], [1], [0], [0], [0, 0, 1, 0], [], []>} : vector<8x32xf32>, vector<1x32xf32>, vector<8x1xf32> -> vector<8x1xf32>
    %42 = vector.broadcast %41 : vector<8x1xf32> to vector<8x8xf32>
    %43 = vector.broadcast %38 : vector<1x8xf32> to vector<8x8xf32>
    %44 = arith.addf %42, %43 : vector<8x8xf32>
    %cst_34 = arith.constant 0.000000e+00 : f32
    %45 = vector.broadcast %cst_34 : f32 to vector<8x8xf32>
    %46 = arith.cmpf oge, %44, %45 : vector<8x8xf32>
    %cst_35 = arith.constant 2.000000e-01 : f32
    %47 = vector.broadcast %cst_35 : f32 to vector<8x8xf32>
    %48 = arith.mulf %47, %44 : vector<8x8xf32>
    %49 = arith.select %46, %44, %48 : vector<8x8xi1>, vector<8x8xf32>
    %50 = arith.addf %49, %2 : vector<8x8xf32>
    %cst_36 = arith.constant dense<0xFF800000> : vector<8xf32>
    %51 = vector.multi_reduction <maximumf>, %50, %cst_36 [1] : vector<8x8xf32> to vector<8xf32>
    %52 = vector.shape_cast %51 : vector<8xf32> to vector<8x1xf32>
    %53 = vector.broadcast %52 : vector<8x1xf32> to vector<8x8xf32>
    %54 = arith.subf %50, %53 : vector<8x8xf32>
    %55 = math.exp %54 : vector<8x8xf32>
    %cst_37 = arith.constant dense<0.000000e+00> : vector<8xf32>
    %56 = vector.multi_reduction <add>, %55, %cst_37 [1] : vector<8x8xf32> to vector<8xf32>
    %57 = vector.shape_cast %56 : vector<8xf32> to vector<8x1xf32>
    %58 = vector.broadcast %57 : vector<8x1xf32> to vector<8x8xf32>
    %59 = arith.divf %55, %58 : vector<8x8xf32>
    %cst_38 = arith.constant dense<0.000000e+00> : vector<8x32xf32>
    %60 = tpu.matmul %59, %34, %cst_38 {dimension_numbers = #tpu.dot_dimension_numbers<[1], [0], [0], [1], [0, 0, 1, 1], [], []>} : vector<8x8xf32>, vector<8x32xf32>, vector<8x32xf32> -> vector<8x32xf32>
    %c2 = arith.constant 2 : index
    %c0_39 = arith.constant 0 : index
    %c0_40 = arith.constant 0 : index
    %61 = vector.load %arg3[%c2, %c0_39, %c0_40] : memref<4x16x32xf32, #tpu.memory_space<vmem>>, vector<1x16x32xf32>
    %62 = vector.shape_cast %61 : vector<1x16x32xf32> to vector<16x32xf32>
    %cst_41 = arith.constant dense<0.000000e+00> : vector<8x32xf32>
    %63 = tpu.matmul %0, %62, %cst_41 {dimension_numbers = #tpu.dot_dimension_numbers<[1], [0], [0], [1], [0, 0, 1, 1], [], []>} : vector<8x16xf32>, vector<16x32xf32>, vector<8x32xf32> -> vector<8x32xf32>
    %cst_42 = arith.constant dense<0.000000e+00> : vector<8x32xf32>
    %64 = tpu.matmul %1, %62, %cst_42 {dimension_numbers = #tpu.dot_dimension_numbers<[1], [0], [0], [1], [0, 0, 1, 1], [], []>} : vector<8x16xf32>, vector<16x32xf32>, vector<8x32xf32> -> vector<8x32xf32>
    %c2_43 = arith.constant 2 : index
    %c0_44 = arith.constant 0 : index
    %c0_45 = arith.constant 0 : index
    %65 = vector.load %arg4[%c2_43, %c0_44, %c0_45] : memref<4x1x32xf32, #tpu.memory_space<vmem>>, vector<1x1x32xf32>
    %66 = vector.shape_cast %65 : vector<1x1x32xf32> to vector<1x32xf32>
    %cst_46 = arith.constant dense<0.000000e+00> : vector<1x8xf32>
    %67 = tpu.matmul %66, %63, %cst_46 {dimension_numbers = #tpu.dot_dimension_numbers<[1], [1], [0], [0], [0, 0, 1, 0], [], []>} : vector<1x32xf32>, vector<8x32xf32>, vector<1x8xf32> -> vector<1x8xf32>
    %c2_47 = arith.constant 2 : index
    %c0_48 = arith.constant 0 : index
    %c0_49 = arith.constant 0 : index
    %68 = vector.load %arg5[%c2_47, %c0_48, %c0_49] : memref<4x1x32xf32, #tpu.memory_space<vmem>>, vector<1x1x32xf32>
    %69 = vector.shape_cast %68 : vector<1x1x32xf32> to vector<1x32xf32>
    %cst_50 = arith.constant dense<0.000000e+00> : vector<8x1xf32>
    %70 = tpu.matmul %64, %69, %cst_50 {dimension_numbers = #tpu.dot_dimension_numbers<[1], [1], [0], [0], [0, 0, 1, 0], [], []>} : vector<8x32xf32>, vector<1x32xf32>, vector<8x1xf32> -> vector<8x1xf32>
    %71 = vector.broadcast %70 : vector<8x1xf32> to vector<8x8xf32>
    %72 = vector.broadcast %67 : vector<1x8xf32> to vector<8x8xf32>
    %73 = arith.addf %71, %72 : vector<8x8xf32>
    %cst_51 = arith.constant 0.000000e+00 : f32
    %74 = vector.broadcast %cst_51 : f32 to vector<8x8xf32>
    %75 = arith.cmpf oge, %73, %74 : vector<8x8xf32>
    %cst_52 = arith.constant 2.000000e-01 : f32
    %76 = vector.broadcast %cst_52 : f32 to vector<8x8xf32>
    %77 = arith.mulf %76, %73 : vector<8x8xf32>
    %78 = arith.select %75, %73, %77 : vector<8x8xi1>, vector<8x8xf32>
    %79 = arith.addf %78, %2 : vector<8x8xf32>
    %cst_53 = arith.constant dense<0xFF800000> : vector<8xf32>
    %80 = vector.multi_reduction <maximumf>, %79, %cst_53 [1] : vector<8x8xf32> to vector<8xf32>
    %81 = vector.shape_cast %80 : vector<8xf32> to vector<8x1xf32>
    %82 = vector.broadcast %81 : vector<8x1xf32> to vector<8x8xf32>
    %83 = arith.subf %79, %82 : vector<8x8xf32>
    %84 = math.exp %83 : vector<8x8xf32>
    %cst_54 = arith.constant dense<0.000000e+00> : vector<8xf32>
    %85 = vector.multi_reduction <add>, %84, %cst_54 [1] : vector<8x8xf32> to vector<8xf32>
    %86 = vector.shape_cast %85 : vector<8xf32> to vector<8x1xf32>
    %87 = vector.broadcast %86 : vector<8x1xf32> to vector<8x8xf32>
    %88 = arith.divf %84, %87 : vector<8x8xf32>
    %cst_55 = arith.constant dense<0.000000e+00> : vector<8x32xf32>
    %89 = tpu.matmul %88, %63, %cst_55 {dimension_numbers = #tpu.dot_dimension_numbers<[1], [0], [0], [1], [0, 0, 1, 1], [], []>} : vector<8x8xf32>, vector<8x32xf32>, vector<8x32xf32> -> vector<8x32xf32>
    %c3 = arith.constant 3 : index
    %c0_56 = arith.constant 0 : index
    %c0_57 = arith.constant 0 : index
    %90 = vector.load %arg3[%c3, %c0_56, %c0_57] : memref<4x16x32xf32, #tpu.memory_space<vmem>>, vector<1x16x32xf32>
    %91 = vector.shape_cast %90 : vector<1x16x32xf32> to vector<16x32xf32>
    %cst_58 = arith.constant dense<0.000000e+00> : vector<8x32xf32>
    %92 = tpu.matmul %0, %91, %cst_58 {dimension_numbers = #tpu.dot_dimension_numbers<[1], [0], [0], [1], [0, 0, 1, 1], [], []>} : vector<8x16xf32>, vector<16x32xf32>, vector<8x32xf32> -> vector<8x32xf32>
    %cst_59 = arith.constant dense<0.000000e+00> : vector<8x32xf32>
    %93 = tpu.matmul %1, %91, %cst_59 {dimension_numbers = #tpu.dot_dimension_numbers<[1], [0], [0], [1], [0, 0, 1, 1], [], []>} : vector<8x16xf32>, vector<16x32xf32>, vector<8x32xf32> -> vector<8x32xf32>
    %c3_60 = arith.constant 3 : index
    %c0_61 = arith.constant 0 : index
    %c0_62 = arith.constant 0 : index
    %94 = vector.load %arg4[%c3_60, %c0_61, %c0_62] : memref<4x1x32xf32, #tpu.memory_space<vmem>>, vector<1x1x32xf32>
    %95 = vector.shape_cast %94 : vector<1x1x32xf32> to vector<1x32xf32>
    %cst_63 = arith.constant dense<0.000000e+00> : vector<1x8xf32>
    %96 = tpu.matmul %95, %92, %cst_63 {dimension_numbers = #tpu.dot_dimension_numbers<[1], [1], [0], [0], [0, 0, 1, 0], [], []>} : vector<1x32xf32>, vector<8x32xf32>, vector<1x8xf32> -> vector<1x8xf32>
    %c3_64 = arith.constant 3 : index
    %c0_65 = arith.constant 0 : index
    %c0_66 = arith.constant 0 : index
    %97 = vector.load %arg5[%c3_64, %c0_65, %c0_66] : memref<4x1x32xf32, #tpu.memory_space<vmem>>, vector<1x1x32xf32>
    %98 = vector.shape_cast %97 : vector<1x1x32xf32> to vector<1x32xf32>
    %cst_67 = arith.constant dense<0.000000e+00> : vector<8x1xf32>
    %99 = tpu.matmul %93, %98, %cst_67 {dimension_numbers = #tpu.dot_dimension_numbers<[1], [1], [0], [0], [0, 0, 1, 0], [], []>} : vector<8x32xf32>, vector<1x32xf32>, vector<8x1xf32> -> vector<8x1xf32>
    %100 = vector.broadcast %99 : vector<8x1xf32> to vector<8x8xf32>
    %101 = vector.broadcast %96 : vector<1x8xf32> to vector<8x8xf32>
    %102 = arith.addf %100, %101 : vector<8x8xf32>
    %cst_68 = arith.constant 0.000000e+00 : f32
    %103 = vector.broadcast %cst_68 : f32 to vector<8x8xf32>
    %104 = arith.cmpf oge, %102, %103 : vector<8x8xf32>
    %cst_69 = arith.constant 2.000000e-01 : f32
    %105 = vector.broadcast %cst_69 : f32 to vector<8x8xf32>
    %106 = arith.mulf %105, %102 : vector<8x8xf32>
    %107 = arith.select %104, %102, %106 : vector<8x8xi1>, vector<8x8xf32>
    %108 = arith.addf %107, %2 : vector<8x8xf32>
    %cst_70 = arith.constant dense<0xFF800000> : vector<8xf32>
    %109 = vector.multi_reduction <maximumf>, %108, %cst_70 [1] : vector<8x8xf32> to vector<8xf32>
    %110 = vector.shape_cast %109 : vector<8xf32> to vector<8x1xf32>
    %111 = vector.broadcast %110 : vector<8x1xf32> to vector<8x8xf32>
    %112 = arith.subf %108, %111 : vector<8x8xf32>
    %113 = math.exp %112 : vector<8x8xf32>
    %cst_71 = arith.constant dense<0.000000e+00> : vector<8xf32>
    %114 = vector.multi_reduction <add>, %113, %cst_71 [1] : vector<8x8xf32> to vector<8xf32>
    %115 = vector.shape_cast %114 : vector<8xf32> to vector<8x1xf32>
    %116 = vector.broadcast %115 : vector<8x1xf32> to vector<8x8xf32>
    %117 = arith.divf %113, %116 : vector<8x8xf32>
    %cst_72 = arith.constant dense<0.000000e+00> : vector<8x32xf32>
    %118 = tpu.matmul %117, %92, %cst_72 {dimension_numbers = #tpu.dot_dimension_numbers<[1], [0], [0], [1], [0, 0, 1, 1], [], []>} : vector<8x8xf32>, vector<8x32xf32>, vector<8x32xf32> -> vector<8x32xf32>
    %119 = tpu.concatenate %31, %60, %89, %118 in 1 : vector<8x32xf32>, vector<8x32xf32>, vector<8x32xf32>, vector<8x32xf32> -> vector<8x128xf32>
    %c0_73 = arith.constant 0 : index
    %c0_74 = arith.constant 0 : index
    %120 = vector.load %arg6[%c0_73, %c0_74] : memref<1x128xf32, #tpu.memory_space<vmem>>, vector<1x128xf32>
    %121 = vector.broadcast %120 : vector<1x128xf32> to vector<8x128xf32>
    %122 = arith.addf %119, %121 : vector<8x128xf32>
    %cst_75 = arith.constant 0.000000e+00 : f32
    %123 = vector.broadcast %cst_75 : f32 to vector<8x128xf32>
    %124 = arith.maximumf %122, %123 : vector<8x128xf32>
    %c0_76 = arith.constant 0 : index
    %c0_77 = arith.constant 0 : index
    %125 = vector.load %arg8[%c0_76, %c0_77] : memref<8x128xf32, #tpu.memory_space<vmem>>, vector<8x128xf32>
    tpu.vector_store %arg8[%c0_76, %c0_77], %124 {strides = array<i32>} : memref<8x128xf32, #tpu.memory_space<vmem>>, vector<8x128xf32>,
    return
  }
  func.func @transform_0(%arg0: i32) -> (i32, i32) {
    %c0_i32 = arith.constant 0 : i32
    %c0_i32_0 = arith.constant 0 : i32
    %c0_i32_1 = arith.constant 0 : i32
    return %c0_i32, %c0_i32_0 : i32, i32
  }
  func.func @transform_1(%arg0: i32) -> (i32, i32) {
    %c0_i32 = arith.constant 0 : i32
    %c0_i32_0 = arith.constant 0 : i32
    return %arg0, %c0_i32 : i32, i32
  }
  func.func @transform_2(%arg0: i32) -> (i32, i32, i32) {
    %c0_i32 = arith.constant 0 : i32
    %c0_i32_0 = arith.constant 0 : i32
    %c0_i32_1 = arith.constant 0 : i32
    %c0_i32_2 = arith.constant 0 : i32
    return %c0_i32, %c0_i32_0, %c0_i32_1 : i32, i32, i32
  }
  func.func @transform_3(%arg0: i32) -> (i32, i32, i32) {
    %c0_i32 = arith.constant 0 : i32
    %c0_i32_0 = arith.constant 0 : i32
    %c0_i32_1 = arith.constant 0 : i32
    %c0_i32_2 = arith.constant 0 : i32
    return %c0_i32, %c0_i32_0, %c0_i32_1 : i32, i32, i32
  }
  func.func @transform_4(%arg0: i32) -> (i32, i32, i32) {
    %c0_i32 = arith.constant 0 : i32
    %c0_i32_0 = arith.constant 0 : i32
    %c0_i32_1 = arith.constant 0 : i32
    %c0_i32_2 = arith.constant 0 : i32
    return %c0_i32, %c0_i32_0, %c0_i32_1 : i32, i32, i32
  }
  func.func @transform_5(%arg0: i32) -> (i32, i32) {
    %c0_i32 = arith.constant 0 : i32
    %c0_i32_0 = arith.constant 0 : i32
    %c0_i32_1 = arith.constant 0 : i32
    return %c0_i32, %c0_i32_0 : i32, i32
  }
  func.func @transform_6(%arg0: i32) -> (i32, i32) {
    %c0_i32 = arith.constant 0 : i32
    %c0_i32_0 = arith.constant 0 : i32
    return %arg0, %c0_i32 : i32, i32
  }
  func.func @transform_7(%arg0: i32) -> (i32, i32) {
    %c0_i32 = arith.constant 0 : i32
    %c0_i32_0 = arith.constant 0 : i32
    return %arg0, %c0_i32 : i32, i32
  }
}

module attributes {stable_mosaic.version = 11 : i64} {
  func.func @_gatN_res_relu_kernel(%arg0: i32, %arg1: memref<8x128xf32, #tpu.memory_space<vmem>>, %arg2: memref<8x128xf32, #tpu.memory_space<vmem>>, %arg3: memref<8x16xf32, #tpu.memory_space<vmem>>, %arg4: memref<4x128x32xf32, #tpu.memory_space<vmem>>, %arg5: memref<4x1x32xf32, #tpu.memory_space<vmem>>, %arg6: memref<4x1x32xf32, #tpu.memory_space<vmem>>, %arg7: memref<1x128xf32, #tpu.memory_space<vmem>>, %arg8: memref<16x128xf32, #tpu.memory_space<vmem>>, %arg9: memref<1x128xf32, #tpu.memory_space<vmem>>, %arg10: memref<8x8xf32, #tpu.memory_space<vmem>>, %arg11: memref<8x128xf32, #tpu.memory_space<vmem>>) attributes {dimension_semantics = [#tpu.dimension_semantics<parallel>], iteration_bounds = array<i64: 1>, scalar_prefetch = 0 : i64, scratch_operands = 0 : i64, tpu.core_type = #tpu.core_type<tc>, window_params = [{pipeline_mode = #tpu.pipeline_mode<synchronous>, transform_indices = @transform_0, window_bounds = array<i64: 8, 128>}, {transform_indices = @transform_1, window_bounds = array<i64: 8, 128>}, {transform_indices = @transform_2, window_bounds = array<i64: 8, 16>}, {pipeline_mode = #tpu.pipeline_mode<synchronous>, transform_indices = @transform_3, window_bounds = array<i64: 4, 128, 32>}, {pipeline_mode = #tpu.pipeline_mode<synchronous>, transform_indices = @transform_4, window_bounds = array<i64: 4, 1, 32>}, {pipeline_mode = #tpu.pipeline_mode<synchronous>, transform_indices = @transform_5, window_bounds = array<i64: 4, 1, 32>}, {pipeline_mode = #tpu.pipeline_mode<synchronous>, transform_indices = @transform_6, window_bounds = array<i64: 1, 128>}, {pipeline_mode = #tpu.pipeline_mode<synchronous>, transform_indices = @transform_7, window_bounds = array<i64: 16, 128>}, {pipeline_mode = #tpu.pipeline_mode<synchronous>, transform_indices = @transform_8, window_bounds = array<i64: 1, 128>}, {transform_indices = @transform_9, window_bounds = array<i64: 8, 8>}, {transform_indices = @transform_10, window_bounds = array<i64: 8, 128>}]} {
    %c0 = arith.constant 0 : index
    %c0_0 = arith.constant 0 : index
    %0 = vector.load %arg1[%c0, %c0_0] : memref<8x128xf32, #tpu.memory_space<vmem>>, vector<8x128xf32>
    %c0_1 = arith.constant 0 : index
    %c0_2 = arith.constant 0 : index
    %1 = vector.load %arg2[%c0_1, %c0_2] : memref<8x128xf32, #tpu.memory_space<vmem>>, vector<8x128xf32>
    %c0_3 = arith.constant 0 : index
    %c0_4 = arith.constant 0 : index
    %2 = vector.load %arg10[%c0_3, %c0_4] : memref<8x8xf32, #tpu.memory_space<vmem>>, vector<8x8xf32>
    %c0_5 = arith.constant 0 : index
    %c0_6 = arith.constant 0 : index
    %c0_7 = arith.constant 0 : index
    %3 = vector.load %arg4[%c0_5, %c0_6, %c0_7] : memref<4x128x32xf32, #tpu.memory_space<vmem>>, vector<1x128x32xf32>
    %4 = vector.shape_cast %3 : vector<1x128x32xf32> to vector<128x32xf32>
    %cst = arith.constant dense<0.000000e+00> : vector<8x32xf32>
    %5 = tpu.matmul %0, %4, %cst {dimension_numbers = #tpu.dot_dimension_numbers<[1], [0], [0], [1], [0, 0, 1, 1], [], []>} : vector<8x128xf32>, vector<128x32xf32>, vector<8x32xf32> -> vector<8x32xf32>
    %cst_8 = arith.constant dense<0.000000e+00> : vector<8x32xf32>
    %6 = tpu.matmul %1, %4, %cst_8 {dimension_numbers = #tpu.dot_dimension_numbers<[1], [0], [0], [1], [0, 0, 1, 1], [], []>} : vector<8x128xf32>, vector<128x32xf32>, vector<8x32xf32> -> vector<8x32xf32>
    %c0_9 = arith.constant 0 : index
    %c0_10 = arith.constant 0 : index
    %c0_11 = arith.constant 0 : index
    %7 = vector.load %arg5[%c0_9, %c0_10, %c0_11] : memref<4x1x32xf32, #tpu.memory_space<vmem>>, vector<1x1x32xf32>
    %8 = vector.shape_cast %7 : vector<1x1x32xf32> to vector<1x32xf32>
    %cst_12 = arith.constant dense<0.000000e+00> : vector<1x8xf32>
    %9 = tpu.matmul %8, %5, %cst_12 {dimension_numbers = #tpu.dot_dimension_numbers<[1], [1], [0], [0], [0, 0, 1, 0], [], []>} : vector<1x32xf32>, vector<8x32xf32>, vector<1x8xf32> -> vector<1x8xf32>
    %c0_13 = arith.constant 0 : index
    %c0_14 = arith.constant 0 : index
    %c0_15 = arith.constant 0 : index
    %10 = vector.load %arg6[%c0_13, %c0_14, %c0_15] : memref<4x1x32xf32, #tpu.memory_space<vmem>>, vector<1x1x32xf32>
    %11 = vector.shape_cast %10 : vector<1x1x32xf32> to vector<1x32xf32>
    %cst_16 = arith.constant dense<0.000000e+00> : vector<8x1xf32>
    %12 = tpu.matmul %6, %11, %cst_16 {dimension_numbers = #tpu.dot_dimension_numbers<[1], [1], [0], [0], [0, 0, 1, 0], [], []>} : vector<8x32xf32>, vector<1x32xf32>, vector<8x1xf32> -> vector<8x1xf32>
    %13 = vector.broadcast %12 : vector<8x1xf32> to vector<8x8xf32>
    %14 = vector.broadcast %9 : vector<1x8xf32> to vector<8x8xf32>
    %15 = arith.addf %13, %14 : vector<8x8xf32>
    %cst_17 = arith.constant 0.000000e+00 : f32
    %16 = vector.broadcast %cst_17 : f32 to vector<8x8xf32>
    %17 = arith.cmpf oge, %15, %16 : vector<8x8xf32>
    %cst_18 = arith.constant 2.000000e-01 : f32
    %18 = vector.broadcast %cst_18 : f32 to vector<8x8xf32>
    %19 = arith.mulf %18, %15 : vector<8x8xf32>
    %20 = arith.select %17, %15, %19 : vector<8x8xi1>, vector<8x8xf32>
    %21 = arith.addf %20, %2 : vector<8x8xf32>
    %cst_19 = arith.constant dense<0xFF800000> : vector<8xf32>
    %22 = vector.multi_reduction <maximumf>, %21, %cst_19 [1] : vector<8x8xf32> to vector<8xf32>
    %23 = vector.shape_cast %22 : vector<8xf32> to vector<8x1xf32>
    %24 = vector.broadcast %23 : vector<8x1xf32> to vector<8x8xf32>
    %25 = arith.subf %21, %24 : vector<8x8xf32>
    %26 = math.exp %25 : vector<8x8xf32>
    %cst_20 = arith.constant dense<0.000000e+00> : vector<8xf32>
    %27 = vector.multi_reduction <add>, %26, %cst_20 [1] : vector<8x8xf32> to vector<8xf32>
    %28 = vector.shape_cast %27 : vector<8xf32> to vector<8x1xf32>
    %29 = vector.broadcast %28 : vector<8x1xf32> to vector<8x8xf32>
    %30 = arith.divf %26, %29 : vector<8x8xf32>
    %cst_21 = arith.constant dense<0.000000e+00> : vector<8x32xf32>
    %31 = tpu.matmul %30, %5, %cst_21 {dimension_numbers = #tpu.dot_dimension_numbers<[1], [0], [0], [1], [0, 0, 1, 1], [], []>} : vector<8x8xf32>, vector<8x32xf32>, vector<8x32xf32> -> vector<8x32xf32>
    %c1 = arith.constant 1 : index
    %c0_22 = arith.constant 0 : index
    %c0_23 = arith.constant 0 : index
    %32 = vector.load %arg4[%c1, %c0_22, %c0_23] : memref<4x128x32xf32, #tpu.memory_space<vmem>>, vector<1x128x32xf32>
    %33 = vector.shape_cast %32 : vector<1x128x32xf32> to vector<128x32xf32>
    %cst_24 = arith.constant dense<0.000000e+00> : vector<8x32xf32>
    %34 = tpu.matmul %0, %33, %cst_24 {dimension_numbers = #tpu.dot_dimension_numbers<[1], [0], [0], [1], [0, 0, 1, 1], [], []>} : vector<8x128xf32>, vector<128x32xf32>, vector<8x32xf32> -> vector<8x32xf32>
    %cst_25 = arith.constant dense<0.000000e+00> : vector<8x32xf32>
    %35 = tpu.matmul %1, %33, %cst_25 {dimension_numbers = #tpu.dot_dimension_numbers<[1], [0], [0], [1], [0, 0, 1, 1], [], []>} : vector<8x128xf32>, vector<128x32xf32>, vector<8x32xf32> -> vector<8x32xf32>
    %c1_26 = arith.constant 1 : index
    %c0_27 = arith.constant 0 : index
    %c0_28 = arith.constant 0 : index
    %36 = vector.load %arg5[%c1_26, %c0_27, %c0_28] : memref<4x1x32xf32, #tpu.memory_space<vmem>>, vector<1x1x32xf32>
    %37 = vector.shape_cast %36 : vector<1x1x32xf32> to vector<1x32xf32>
    %cst_29 = arith.constant dense<0.000000e+00> : vector<1x8xf32>
    %38 = tpu.matmul %37, %34, %cst_29 {dimension_numbers = #tpu.dot_dimension_numbers<[1], [1], [0], [0], [0, 0, 1, 0], [], []>} : vector<1x32xf32>, vector<8x32xf32>, vector<1x8xf32> -> vector<1x8xf32>
    %c1_30 = arith.constant 1 : index
    %c0_31 = arith.constant 0 : index
    %c0_32 = arith.constant 0 : index
    %39 = vector.load %arg6[%c1_30, %c0_31, %c0_32] : memref<4x1x32xf32, #tpu.memory_space<vmem>>, vector<1x1x32xf32>
    %40 = vector.shape_cast %39 : vector<1x1x32xf32> to vector<1x32xf32>
    %cst_33 = arith.constant dense<0.000000e+00> : vector<8x1xf32>
    %41 = tpu.matmul %35, %40, %cst_33 {dimension_numbers = #tpu.dot_dimension_numbers<[1], [1], [0], [0], [0, 0, 1, 0], [], []>} : vector<8x32xf32>, vector<1x32xf32>, vector<8x1xf32> -> vector<8x1xf32>
    %42 = vector.broadcast %41 : vector<8x1xf32> to vector<8x8xf32>
    %43 = vector.broadcast %38 : vector<1x8xf32> to vector<8x8xf32>
    %44 = arith.addf %42, %43 : vector<8x8xf32>
    %cst_34 = arith.constant 0.000000e+00 : f32
    %45 = vector.broadcast %cst_34 : f32 to vector<8x8xf32>
    %46 = arith.cmpf oge, %44, %45 : vector<8x8xf32>
    %cst_35 = arith.constant 2.000000e-01 : f32
    %47 = vector.broadcast %cst_35 : f32 to vector<8x8xf32>
    %48 = arith.mulf %47, %44 : vector<8x8xf32>
    %49 = arith.select %46, %44, %48 : vector<8x8xi1>, vector<8x8xf32>
    %50 = arith.addf %49, %2 : vector<8x8xf32>
    %cst_36 = arith.constant dense<0xFF800000> : vector<8xf32>
    %51 = vector.multi_reduction <maximumf>, %50, %cst_36 [1] : vector<8x8xf32> to vector<8xf32>
    %52 = vector.shape_cast %51 : vector<8xf32> to vector<8x1xf32>
    %53 = vector.broadcast %52 : vector<8x1xf32> to vector<8x8xf32>
    %54 = arith.subf %50, %53 : vector<8x8xf32>
    %55 = math.exp %54 : vector<8x8xf32>
    %cst_37 = arith.constant dense<0.000000e+00> : vector<8xf32>
    %56 = vector.multi_reduction <add>, %55, %cst_37 [1] : vector<8x8xf32> to vector<8xf32>
    %57 = vector.shape_cast %56 : vector<8xf32> to vector<8x1xf32>
    %58 = vector.broadcast %57 : vector<8x1xf32> to vector<8x8xf32>
    %59 = arith.divf %55, %58 : vector<8x8xf32>
    %cst_38 = arith.constant dense<0.000000e+00> : vector<8x32xf32>
    %60 = tpu.matmul %59, %34, %cst_38 {dimension_numbers = #tpu.dot_dimension_numbers<[1], [0], [0], [1], [0, 0, 1, 1], [], []>} : vector<8x8xf32>, vector<8x32xf32>, vector<8x32xf32> -> vector<8x32xf32>
    %c2 = arith.constant 2 : index
    %c0_39 = arith.constant 0 : index
    %c0_40 = arith.constant 0 : index
    %61 = vector.load %arg4[%c2, %c0_39, %c0_40] : memref<4x128x32xf32, #tpu.memory_space<vmem>>, vector<1x128x32xf32>
    %62 = vector.shape_cast %61 : vector<1x128x32xf32> to vector<128x32xf32>
    %cst_41 = arith.constant dense<0.000000e+00> : vector<8x32xf32>
    %63 = tpu.matmul %0, %62, %cst_41 {dimension_numbers = #tpu.dot_dimension_numbers<[1], [0], [0], [1], [0, 0, 1, 1], [], []>} : vector<8x128xf32>, vector<128x32xf32>, vector<8x32xf32> -> vector<8x32xf32>
    %cst_42 = arith.constant dense<0.000000e+00> : vector<8x32xf32>
    %64 = tpu.matmul %1, %62, %cst_42 {dimension_numbers = #tpu.dot_dimension_numbers<[1], [0], [0], [1], [0, 0, 1, 1], [], []>} : vector<8x128xf32>, vector<128x32xf32>, vector<8x32xf32> -> vector<8x32xf32>
    %c2_43 = arith.constant 2 : index
    %c0_44 = arith.constant 0 : index
    %c0_45 = arith.constant 0 : index
    %65 = vector.load %arg5[%c2_43, %c0_44, %c0_45] : memref<4x1x32xf32, #tpu.memory_space<vmem>>, vector<1x1x32xf32>
    %66 = vector.shape_cast %65 : vector<1x1x32xf32> to vector<1x32xf32>
    %cst_46 = arith.constant dense<0.000000e+00> : vector<1x8xf32>
    %67 = tpu.matmul %66, %63, %cst_46 {dimension_numbers = #tpu.dot_dimension_numbers<[1], [1], [0], [0], [0, 0, 1, 0], [], []>} : vector<1x32xf32>, vector<8x32xf32>, vector<1x8xf32> -> vector<1x8xf32>
    %c2_47 = arith.constant 2 : index
    %c0_48 = arith.constant 0 : index
    %c0_49 = arith.constant 0 : index
    %68 = vector.load %arg6[%c2_47, %c0_48, %c0_49] : memref<4x1x32xf32, #tpu.memory_space<vmem>>, vector<1x1x32xf32>
    %69 = vector.shape_cast %68 : vector<1x1x32xf32> to vector<1x32xf32>
    %cst_50 = arith.constant dense<0.000000e+00> : vector<8x1xf32>
    %70 = tpu.matmul %64, %69, %cst_50 {dimension_numbers = #tpu.dot_dimension_numbers<[1], [1], [0], [0], [0, 0, 1, 0], [], []>} : vector<8x32xf32>, vector<1x32xf32>, vector<8x1xf32> -> vector<8x1xf32>
    %71 = vector.broadcast %70 : vector<8x1xf32> to vector<8x8xf32>
    %72 = vector.broadcast %67 : vector<1x8xf32> to vector<8x8xf32>
    %73 = arith.addf %71, %72 : vector<8x8xf32>
    %cst_51 = arith.constant 0.000000e+00 : f32
    %74 = vector.broadcast %cst_51 : f32 to vector<8x8xf32>
    %75 = arith.cmpf oge, %73, %74 : vector<8x8xf32>
    %cst_52 = arith.constant 2.000000e-01 : f32
    %76 = vector.broadcast %cst_52 : f32 to vector<8x8xf32>
    %77 = arith.mulf %76, %73 : vector<8x8xf32>
    %78 = arith.select %75, %73, %77 : vector<8x8xi1>, vector<8x8xf32>
    %79 = arith.addf %78, %2 : vector<8x8xf32>
    %cst_53 = arith.constant dense<0xFF800000> : vector<8xf32>
    %80 = vector.multi_reduction <maximumf>, %79, %cst_53 [1] : vector<8x8xf32> to vector<8xf32>
    %81 = vector.shape_cast %80 : vector<8xf32> to vector<8x1xf32>
    %82 = vector.broadcast %81 : vector<8x1xf32> to vector<8x8xf32>
    %83 = arith.subf %79, %82 : vector<8x8xf32>
    %84 = math.exp %83 : vector<8x8xf32>
    %cst_54 = arith.constant dense<0.000000e+00> : vector<8xf32>
    %85 = vector.multi_reduction <add>, %84, %cst_54 [1] : vector<8x8xf32> to vector<8xf32>
    %86 = vector.shape_cast %85 : vector<8xf32> to vector<8x1xf32>
    %87 = vector.broadcast %86 : vector<8x1xf32> to vector<8x8xf32>
    %88 = arith.divf %84, %87 : vector<8x8xf32>
    %cst_55 = arith.constant dense<0.000000e+00> : vector<8x32xf32>
    %89 = tpu.matmul %88, %63, %cst_55 {dimension_numbers = #tpu.dot_dimension_numbers<[1], [0], [0], [1], [0, 0, 1, 1], [], []>} : vector<8x8xf32>, vector<8x32xf32>, vector<8x32xf32> -> vector<8x32xf32>
    %c3 = arith.constant 3 : index
    %c0_56 = arith.constant 0 : index
    %c0_57 = arith.constant 0 : index
    %90 = vector.load %arg4[%c3, %c0_56, %c0_57] : memref<4x128x32xf32, #tpu.memory_space<vmem>>, vector<1x128x32xf32>
    %91 = vector.shape_cast %90 : vector<1x128x32xf32> to vector<128x32xf32>
    %cst_58 = arith.constant dense<0.000000e+00> : vector<8x32xf32>
    %92 = tpu.matmul %0, %91, %cst_58 {dimension_numbers = #tpu.dot_dimension_numbers<[1], [0], [0], [1], [0, 0, 1, 1], [], []>} : vector<8x128xf32>, vector<128x32xf32>, vector<8x32xf32> -> vector<8x32xf32>
    %cst_59 = arith.constant dense<0.000000e+00> : vector<8x32xf32>
    %93 = tpu.matmul %1, %91, %cst_59 {dimension_numbers = #tpu.dot_dimension_numbers<[1], [0], [0], [1], [0, 0, 1, 1], [], []>} : vector<8x128xf32>, vector<128x32xf32>, vector<8x32xf32> -> vector<8x32xf32>
    %c3_60 = arith.constant 3 : index
    %c0_61 = arith.constant 0 : index
    %c0_62 = arith.constant 0 : index
    %94 = vector.load %arg5[%c3_60, %c0_61, %c0_62] : memref<4x1x32xf32, #tpu.memory_space<vmem>>, vector<1x1x32xf32>
    %95 = vector.shape_cast %94 : vector<1x1x32xf32> to vector<1x32xf32>
    %cst_63 = arith.constant dense<0.000000e+00> : vector<1x8xf32>
    %96 = tpu.matmul %95, %92, %cst_63 {dimension_numbers = #tpu.dot_dimension_numbers<[1], [1], [0], [0], [0, 0, 1, 0], [], []>} : vector<1x32xf32>, vector<8x32xf32>, vector<1x8xf32> -> vector<1x8xf32>
    %c3_64 = arith.constant 3 : index
    %c0_65 = arith.constant 0 : index
    %c0_66 = arith.constant 0 : index
    %97 = vector.load %arg6[%c3_64, %c0_65, %c0_66] : memref<4x1x32xf32, #tpu.memory_space<vmem>>, vector<1x1x32xf32>
    %98 = vector.shape_cast %97 : vector<1x1x32xf32> to vector<1x32xf32>
    %cst_67 = arith.constant dense<0.000000e+00> : vector<8x1xf32>
    %99 = tpu.matmul %93, %98, %cst_67 {dimension_numbers = #tpu.dot_dimension_numbers<[1], [1], [0], [0], [0, 0, 1, 0], [], []>} : vector<8x32xf32>, vector<1x32xf32>, vector<8x1xf32> -> vector<8x1xf32>
    %100 = vector.broadcast %99 : vector<8x1xf32> to vector<8x8xf32>
    %101 = vector.broadcast %96 : vector<1x8xf32> to vector<8x8xf32>
    %102 = arith.addf %100, %101 : vector<8x8xf32>
    %cst_68 = arith.constant 0.000000e+00 : f32
    %103 = vector.broadcast %cst_68 : f32 to vector<8x8xf32>
    %104 = arith.cmpf oge, %102, %103 : vector<8x8xf32>
    %cst_69 = arith.constant 2.000000e-01 : f32
    %105 = vector.broadcast %cst_69 : f32 to vector<8x8xf32>
    %106 = arith.mulf %105, %102 : vector<8x8xf32>
    %107 = arith.select %104, %102, %106 : vector<8x8xi1>, vector<8x8xf32>
    %108 = arith.addf %107, %2 : vector<8x8xf32>
    %cst_70 = arith.constant dense<0xFF800000> : vector<8xf32>
    %109 = vector.multi_reduction <maximumf>, %108, %cst_70 [1] : vector<8x8xf32> to vector<8xf32>
    %110 = vector.shape_cast %109 : vector<8xf32> to vector<8x1xf32>
    %111 = vector.broadcast %110 : vector<8x1xf32> to vector<8x8xf32>
    %112 = arith.subf %108, %111 : vector<8x8xf32>
    %113 = math.exp %112 : vector<8x8xf32>
    %cst_71 = arith.constant dense<0.000000e+00> : vector<8xf32>
    %114 = vector.multi_reduction <add>, %113, %cst_71 [1] : vector<8x8xf32> to vector<8xf32>
    %115 = vector.shape_cast %114 : vector<8xf32> to vector<8x1xf32>
    %116 = vector.broadcast %115 : vector<8x1xf32> to vector<8x8xf32>
    %117 = arith.divf %113, %116 : vector<8x8xf32>
    %cst_72 = arith.constant dense<0.000000e+00> : vector<8x32xf32>
    %118 = tpu.matmul %117, %92, %cst_72 {dimension_numbers = #tpu.dot_dimension_numbers<[1], [0], [0], [1], [0, 0, 1, 1], [], []>} : vector<8x8xf32>, vector<8x32xf32>, vector<8x32xf32> -> vector<8x32xf32>
    %119 = tpu.concatenate %31, %60, %89, %118 in 1 : vector<8x32xf32>, vector<8x32xf32>, vector<8x32xf32>, vector<8x32xf32> -> vector<8x128xf32>
    %c0_73 = arith.constant 0 : index
    %c0_74 = arith.constant 0 : index
    %120 = vector.load %arg3[%c0_73, %c0_74] : memref<8x16xf32, #tpu.memory_space<vmem>>, vector<8x16xf32>
    %c0_75 = arith.constant 0 : index
    %c0_76 = arith.constant 0 : index
    %121 = vector.load %arg8[%c0_75, %c0_76] : memref<16x128xf32, #tpu.memory_space<vmem>>, vector<16x128xf32>
    %cst_77 = arith.constant dense<0.000000e+00> : vector<8x128xf32>
    %122 = tpu.matmul %120, %121, %cst_77 {dimension_numbers = #tpu.dot_dimension_numbers<[1], [0], [0], [1], [0, 0, 1, 1], [], []>} : vector<8x16xf32>, vector<16x128xf32>, vector<8x128xf32> -> vector<8x128xf32>
    %c0_78 = arith.constant 0 : index
    %c0_79 = arith.constant 0 : index
    %123 = vector.load %arg9[%c0_78, %c0_79] : memref<1x128xf32, #tpu.memory_space<vmem>>, vector<1x128xf32>
    %124 = vector.broadcast %123 : vector<1x128xf32> to vector<8x128xf32>
    %125 = arith.addf %122, %124 : vector<8x128xf32>
    %c0_80 = arith.constant 0 : index
    %c0_81 = arith.constant 0 : index
    %126 = vector.load %arg7[%c0_80, %c0_81] : memref<1x128xf32, #tpu.memory_space<vmem>>, vector<1x128xf32>
    %127 = vector.broadcast %126 : vector<1x128xf32> to vector<8x128xf32>
    %128 = arith.addf %119, %127 : vector<8x128xf32>
    %129 = arith.addf %128, %125 : vector<8x128xf32>
    %cst_82 = arith.constant 0.000000e+00 : f32
    %130 = vector.broadcast %cst_82 : f32 to vector<8x128xf32>
    %131 = arith.maximumf %129, %130 : vector<8x128xf32>
    %c0_83 = arith.constant 0 : index
    %c0_84 = arith.constant 0 : index
    %132 = vector.load %arg11[%c0_83, %c0_84] : memref<8x128xf32, #tpu.memory_space<vmem>>, vector<8x128xf32>
    tpu.vector_store %arg11[%c0_83, %c0_84], %131 {strides = array<i32>} : memref<8x128xf32, #tpu.memory_space<vmem>>, vector<8x128xf32>,
    return
  }
  func.func @transform_0(%arg0: i32) -> (i32, i32) {
    %c0_i32 = arith.constant 0 : i32
    %c0_i32_0 = arith.constant 0 : i32
    %c0_i32_1 = arith.constant 0 : i32
    return %c0_i32, %c0_i32_0 : i32, i32
  }
  func.func @transform_1(%arg0: i32) -> (i32, i32) {
    %c0_i32 = arith.constant 0 : i32
    %c0_i32_0 = arith.constant 0 : i32
    return %arg0, %c0_i32 : i32, i32
  }
  func.func @transform_2(%arg0: i32) -> (i32, i32) {
    %c0_i32 = arith.constant 0 : i32
    %c0_i32_0 = arith.constant 0 : i32
    return %arg0, %c0_i32 : i32, i32
  }
  func.func @transform_3(%arg0: i32) -> (i32, i32, i32) {
    %c0_i32 = arith.constant 0 : i32
    %c0_i32_0 = arith.constant 0 : i32
    %c0_i32_1 = arith.constant 0 : i32
    %c0_i32_2 = arith.constant 0 : i32
    return %c0_i32, %c0_i32_0, %c0_i32_1 : i32, i32, i32
  }
  func.func @transform_4(%arg0: i32) -> (i32, i32, i32) {
    %c0_i32 = arith.constant 0 : i32
    %c0_i32_0 = arith.constant 0 : i32
    %c0_i32_1 = arith.constant 0 : i32
    %c0_i32_2 = arith.constant 0 : i32
    return %c0_i32, %c0_i32_0, %c0_i32_1 : i32, i32, i32
  }
  func.func @transform_5(%arg0: i32) -> (i32, i32, i32) {
    %c0_i32 = arith.constant 0 : i32
    %c0_i32_0 = arith.constant 0 : i32
    %c0_i32_1 = arith.constant 0 : i32
    %c0_i32_2 = arith.constant 0 : i32
    return %c0_i32, %c0_i32_0, %c0_i32_1 : i32, i32, i32
  }
  func.func @transform_6(%arg0: i32) -> (i32, i32) {
    %c0_i32 = arith.constant 0 : i32
    %c0_i32_0 = arith.constant 0 : i32
    %c0_i32_1 = arith.constant 0 : i32
    return %c0_i32, %c0_i32_0 : i32, i32
  }
  func.func @transform_7(%arg0: i32) -> (i32, i32) {
    %c0_i32 = arith.constant 0 : i32
    %c0_i32_0 = arith.constant 0 : i32
    %c0_i32_1 = arith.constant 0 : i32
    return %c0_i32, %c0_i32_0 : i32, i32
  }
  func.func @transform_8(%arg0: i32) -> (i32, i32) {
    %c0_i32 = arith.constant 0 : i32
    %c0_i32_0 = arith.constant 0 : i32
    %c0_i32_1 = arith.constant 0 : i32
    return %c0_i32, %c0_i32_0 : i32, i32
  }
  func.func @transform_9(%arg0: i32) -> (i32, i32) {
    %c0_i32 = arith.constant 0 : i32
    %c0_i32_0 = arith.constant 0 : i32
    return %arg0, %c0_i32 : i32, i32
  }
  func.func @transform_10(%arg0: i32) -> (i32, i32) {
    %c0_i32 = arith.constant 0 : i32
    %c0_i32_0 = arith.constant 0 : i32
    return %arg0, %c0_i32 : i32, i32
  }
}

</mosaic_0001>

<bundles_post_ra>
// kernel: multigat_forward.2
= control target key start
LH: loop header
LB: loop body
LE: loop exit
PB: predicated region body
PF: predicated region fallthrough
CT: control target
= control target key end

     0   :  { %12 = vsyncpa [#allocation3], 0  ;;  %s940_s0 = inlined_call_operand.vmem [shape: f32[8,16], index: 0, kind: input, shape index: {}, may-alias: {0,1}]   ;;  %s941_s1 = inlined_call_operand.vmem [shape: f32[8,16], index: 1, kind: input, shape index: {}, may-alias: {0,1}]   ;;  %s942_s2 = inlined_call_operand.hbm [shape: f32[4,16,32], index: 2, kind: input, shape index: {}]   ;;  %s943_s3 = inlined_call_operand.hbm [shape: f32[4,1,32], index: 3, kind: input, shape index: {}]   ;;  %s944_s4 = inlined_call_operand.hbm [shape: f32[4,1,32], index: 4, kind: input, shape index: {}]   ;;  %s945_s5 = inlined_call_operand.hbm [shape: f32[1,128], index: 5, kind: input, shape index: {}]   ;;  %s946_s6 = inlined_call_operand.vmem [shape: f32[8,8], index: 6, kind: input, shape index: {}]   ;;  %s947_s7 = inlined_call_operand.vmem [shape: f32[8,128], index: 7, kind: output, shape index: {}]  }
   0x1   :  { %13 = vsyncpa [#allocation5], 0  ;;  %s36_s26 = sshll.u32 %s943_s3, 4  ;;  %s37_s26 = int_to_ptr.hbm [resolvable:$true] %s36_s26 }
   0x2   :  { %14 = vsyncpa [#allocation8], 0  ;;  %s813_s27 = smov [#allocation4]   ;;  %s23_s8 = sshll.u32 %s942_s2, 4  ;;  %s24_s8 = int_to_ptr.hbm [resolvable:$true] %s23_s8 }
   0x3   :  { %s38_s28 = sshll.u32 %s813_s27, 4  ;;  %s814_s9 = smov 16   ;;  %s39_s28 = int_to_ptr.vmem [resolvable:$true] %s38_s28 }
   0x4   :  { %s815_s10 = smov 1   ;;  %s816_s11 = smov [#allocation2]  }
   0x5   :  { %44 = dma.hbm_to_vmem [thread:$0]  %s37_s26, 64, %s39_s28, [#allocation5], %s814_s9, %s814_s9, %s815_s10  }
   0x6   :  { %s25_s12 = sshll.u32 %s816_s11, 4  ;;  %s817_s13 = smov 128   ;;  %s26_s12 = int_to_ptr.vmem [resolvable:$true] %s25_s12 }
   0x7   :  { %s818_s14 = smov 8   ;;  %s49_s16 = sshll.u32 %s944_s4, 4  ;;  %s50_s16 = int_to_ptr.hbm [resolvable:$true] %s49_s16 }
   0x8   :  { %31 = dma.hbm_to_vmem [thread:$0]  %s24_s8, 1024, %s26_s12, [#allocation3], %s817_s13, %s817_s13, %s818_s14  }
   0x9   :  { %s819_s17 = smov [#allocation6]   ;;  %s63_s20 = sshll.u32 %s945_s5, 4  ;;  %s64_s20 = int_to_ptr.hbm [resolvable:$true] %s63_s20 }
   0xa   :  { %s51_s18 = sshll.u32 %s819_s17, 4  ;;  %s820_s21 = smov [#allocation7]   ;;  %s52_s18 = int_to_ptr.vmem [resolvable:$true] %s51_s18 }
   0xb   :  { %57 = dma.hbm_to_vmem [thread:$0]  %s50_s16, 64, %s52_s18, [#allocation5], %s814_s9, %s814_s9, %s815_s10  }
   0xc   :  { %s65_s22 = sshll.u32 %s820_s21, 4  ;;  %s66_s22 = int_to_ptr.vmem [resolvable:$true] %s65_s22 }
   0xd   :  { %68 = dma.hbm_to_vmem [thread:$0]  %s64_s20, 16, %s66_s22, [#allocation8]  }
   0xe   :  { %807 = dma.done.wait [#allocation3], 1024  }
   0xf   :  { %808 = vsyncadd [#allocation3], 4294966272 }
  0x10   :  { %809 = dma.done.wait [#allocation5], 128  }
  0x11   :  { %810 = vsyncadd [#allocation5], 4294967168 }
  0x12   :  { %811 = dma.done.wait [#allocation8], 16  }
  0x13   :  { %812 = vsyncadd [#allocation8], 4294967280  ;;  %v91_v0 = vld [vmem:[#allocation2 + $0x8] sm:$0xff]  ;;  %v90_v1 = vld [vmem:[#allocation2] sm:$0xff]  ;;  %vm92_vm0 = vcmask 130048   ;;  %vm140_vm1 = vcmask 261120  }
  0x14   :  { %v879_v2 = vld [vmem:[%s940_s0] sm:$0xff]  ;;  %110 = vmatpush.msra.mxu0 %v91_v0  ;;  %133 = vmatpush.msra.mxu1 %v91_v0  ;;  %vm181_vm3 = vcmask 64512   ;;  %v231_v24 = vld [vmem:[#allocation2 + $0x18] sm:$0xff]  ;;  %v230_v25 = vld [vmem:[#allocation2 + $0x10] sm:$0xff]  ;;  %s822_s25 = smov 64   ;;  %s823_s26 = smov 96  }
  0x15   :  { %v88_v3 = vld [vmem:[%s941_s1] sm:$0xff]  ;;  %v364_v26 = vld [vmem:[#allocation2 + $0x28] sm:$0xff]  ;;  %v497_v29 = vld [vmem:[#allocation2 + $0x38] sm:$0xff] }
  0x16   :  { %111 = vmatpush.msra.mxu0 %v90_v1  ;;  %134 = vmatpush.msra.mxu1 %v90_v1  ;;  %v690_v4 = vld [vmem:[#allocation6] ss:$0 sm:$0xff]  ;;  %v139_v7 = vld [vmem:[#allocation4] sm:$0x1]  ;;  %v496_v30 = vld [vmem:[#allocation2 + $0x30] sm:$0xff] }
  0x17   :  { %659 = vmatmul.msk.f32.vlgmr.msra.gmra.mxu0 %vm92_vm0, %v879_v2  ;;  %660 = vmatmul.msk.f32.vlgmr.msra.gmra.mxu1 %vm92_vm0, %v88_v3  ;;  %v893_v15 = vld [vmem:[%s946_s6] sm:$0xff]  ;;  %s821_s6 = smov 32  }
  0x18   :  { %266 = vmatpush.msrb.mxu0 %v231_v24  ;;  %v363_v27 = vld [vmem:[#allocation2 + $0x20] sm:$0xff] }
  0x19   :  { %v691_v43 = vld [vmem:[#allocation6 + $0x1] ss:$0 sm:$0xff]  ;;  %v692_v47 = vld [vmem:[#allocation6 + $0x2] ss:$0 sm:$0xff]  ;;  %v693_v50 = vld [vmem:[#allocation6 + $0x3] ss:$0 sm:$0xff] }
  0x1a   :  { %267 = vmatpush.msrb.mxu0 %v230_v25  ;;  %v273_v56 = vld [vmem:[#allocation4 + $0x1] sm:$0x1]  ;;  %v406_v58 = vld [vmem:[#allocation4 + $0x2] sm:$0x1]  ;;  %v539_v60 = vld [vmem:[#allocation4 + $0x3] sm:$0x1] }
  0x1c   :  { %399 = vmatpush.msra.mxu0 %v364_v26 }
  0x1e   :  { %400 = vmatpush.msra.mxu0 %v363_v27 }
  0x1f   :  { %665 = vmatmul.msk.f32.vlgmr.msrb.gmra.mxu0 %vm92_vm0, %v88_v3 }
  0x20   :  { %532 = vmatpush.msrb.mxu0 %v497_v29 }
  0x22   :  { %533 = vmatpush.msrb.mxu0 %v496_v30 }
  0x27   :  { %670 = vmatmul.msk.f32.vlgmr.msra.gmra.mxu0 %vm92_vm0, %v88_v3 }
  0x2f   :  { %675 = vmatmul.msk.f32.vlgmr.msrb.gmra.mxu0 %vm92_vm0, %v88_v3 }
  0x94   :  { %v113_v5 = vpop.f32.mrf.mxu0  ;;  %v136_v6 = vpop.f32.mrf.mxu1 }
  0x95   :  { %661 = vmatpush.xpose.msk.msra.mxu2 %vm140_vm1, %v113_v5  ;;  %224 = vmatpush.msra.mxu3 %v113_v5  ;;  %v171_v8 = vmul.f32 %v690_v4, %v136_v6 }
  0x97   :  { %v172_v9 = vsel %vm140_vm1, %v171_v8, 0.0  ;;  %246 = vmatpush.msrb.mxu3 %v231_v24 }
  0x98   :  { %662 = vmatmul.msk.f32.vlgmr.msra.gmra.mxu2 %vm140_vm1, %v139_v7  ;;  %173 = vadd.xlane.f32.xlu0 %v172_v9 }
  0x99   :  { %247 = vmatpush.msrb.mxu3 %v230_v25 }
  0x9c   :  { %v269_v42 = vpop.f32.mrf.mxu0 }
  0x9d   :  { %v305_v44 = vmul.f32 %v691_v43, %v269_v42 }
  0x9f   :  { %v306_v45 = vsel %vm140_vm1, %v305_v44, 0.0 }
  0xa4   :  { %v402_v46 = vpop.f32.mrf.mxu0 }
  0xa5   :  { %v438_v48 = vmul.f32 %v692_v47, %v402_v46 }
  0xa7   :  { %v439_v49 = vsel %vm140_vm1, %v438_v48, 0.0 }
  0xa8   :  { %440 = vadd.xlane.f32.xlu2 %v439_v49 }
  0xac   :  { %v535_v52 = vpop.f32.mrf.mxu0 }
  0xad   :  { %v571_v53 = vmul.f32 %v693_v50, %v535_v52 }
  0xaf   :  { %v572_v54 = vsel %vm140_vm1, %v571_v53, 0.0 }
  0xb0   :  { %573 = vadd.xlane.f32.xlu2 %v572_v54 }
 0x10b   :  { %v174_v11 = vpop.xlane.xlu0 %173 }
 0x11b   :  { %v164_v10 = vpop.f32.mrf.mxu2 }
 0x11c   :  { %v175_v12 = vperm.slane %v164_v10, 0 }
 0x11e   :  { %v176_v13 = vadd.f32 %v175_v12, %v174_v11 }
 0x120   :  { %vm177_vm2 = vcmp.ge.f32.partialorder %v176_v13, 0.0  ;;  %v178_v14 = vmul.f32 0.2, %v176_v13 }
 0x122   :  { %v179_v16 = vsel %vm177_vm2, %v176_v13, %v178_v14 }
 0x123   :  { %v180_v17 = vadd.f32 %v179_v16, %v893_v15 }
 0x125   :  { %v182_v18 = vsel %vm181_vm3, %v180_v17, -inf }
 0x126   :  { %183 = vmax.xlane.f32.xlu0 %v182_v18 }
 0x199   :  { %v184_v19 = vpop.xlane.xlu0 %183 }
 0x19a   :  { %v185_v20 = vsub.f32 %v180_v17, %v184_v19 }
 0x19c   :  { %v186_v21 = vmul.f32 1.442695, %v185_v20 }
 0x19e   :  { %695 = vpow2.f32 %v186_v21 }
 0x1a4   :  { %v696_v22 = vpop.eup %695 }
 0x1a5   :  { %v188_v23 = vsel %vm181_vm3, %v696_v22, 0.0 }
 0x1a6   :  { %189 = vadd.xlane.f32.xlu1 %v188_v23 }
 0x1ae   :  { %307 = vadd.xlane.f32.xlu1 %v306_v45 }
 0x219   :  { %v190_v28 = vpop.xlane.xlu1 %189 }
 0x21a   :  { %697 = vrcp.f32 %v190_v28  ;;  %v202_v34 = vand.u32 2147483648, %v190_v28  ;;  %v200_v36 = vand.u32 2147483647, %v190_v28  ;;  %vm196_vm5 = vweird.f32 %v190_v28 }
 0x21c   :  { %v203_v38 = vor.u32 1.1754944e-38, %v202_v34  ;;  %vm201_vm7 = vcmp.eq.f32.partialorder %v200_v36, 8.507059e+37 }
 0x220   :  { %v698_v31 = vpop.eup %697 }
 0x221   :  { %v192_v32 = vmul.f32 %v698_v31, %v190_v28  ;;  %vm197_vm4 = vweird.f32 %v698_v31  ;;  %v308_v62 = vpop.xlane.xlu1 %307 }
 0x222   :  { %vm198_vm6 = vmor %vm196_vm5, %vm197_vm4 }
 0x223   :  { %v193_v33 = vsub.f32 1.0, %v192_v32 }
 0x225   :  { %v194_v35 = vmul.f32 %v698_v31, %v193_v33 }
 0x227   :  { %v195_v37 = vadd.f32 %v698_v31, %v194_v35 }
 0x229   :  { %v199_v39 = vsel %vm198_vm6, %v698_v31, %v195_v37 }
 0x22a   :  { %v204_v40 = vsel %vm201_vm7, %v203_v38, %v199_v39 }
 0x22b   :  { %v205_v41 = vmul.f32 %v696_v22, %v204_v40 }
 0x22d   :  { %663 = vmatmul.msk.f32.vlgmr.msra.gmra.mxu3 %vm181_vm3, %v205_v41 }
 0x22e   :  { %379 = vmatpush.msra.mxu3 %v364_v26 }
 0x230   :  { %380 = vmatpush.msra.mxu3 %v363_v27 }
 0x235   :  { %664 = vmatmul.msk.f32.vlgmr.msrb.gmra.mxu3 %vm92_vm0, %v879_v2 }
 0x236   :  { %512 = vmatpush.msrb.mxu3 %v497_v29 }
 0x238   :  { %513 = vmatpush.msrb.mxu3 %v496_v30 }
 0x23d   :  { %669 = vmatmul.msk.f32.vlgmr.msra.gmra.mxu3 %vm92_vm0, %v879_v2 }
 0x245   :  { %674 = vmatmul.msk.f32.vlgmr.msrb.gmra.mxu3 %vm92_vm0, %v879_v2  ;;  %v441_v2 = vpop.xlane.xlu2 %440 }
 0x24d   :  { %v574_v12 = vpop.xlane.xlu2 %573 }
 0x2b0   :  { %v910_v51 = vpop.f32.mrf.mxu3 }
 0x2b8   :  { %v249_v55 = vpop.f32.mrf.mxu3 }
 0x2b9   :  { %666 = vmatpush.xpose.msk.msrb.mxu1 %vm140_vm1, %v249_v55  ;;  %357 = vmatpush.msrb.mxu2 %v249_v55 }
 0x2bc   :  { %667 = vmatmul.msk.f32.vlgmr.msrb.gmra.mxu1 %vm140_vm1, %v273_v56 }
 0x2c0   :  { %v382_v57 = vpop.f32.mrf.mxu3 }
 0x2c1   :  { %671 = vmatpush.xpose.msk.msra.mxu1 %vm140_vm1, %v382_v57  ;;  %490 = vmatpush.msra.mxu2 %v382_v57 }
 0x2c4   :  { %672 = vmatmul.msk.f32.vlgmr.msra.gmra.mxu1 %vm140_vm1, %v406_v58 }
 0x2c8   :  { %v917_v59 = vpop.f32.mrf.mxu3 }
 0x2c9   :  { %676 = vmatpush.xpose.msk.msrb.mxu1 %vm140_vm1, %v917_v59 }
 0x2cc   :  { %677 = vmatmul.msk.f32.vlgmr.msrb.gmra.mxu1 %vm140_vm1, %v539_v60 }
 0x339   :  { %v297_v61 = vpop.f32.mrf.mxu1 }
 0x33a   :  { %v309_v63 = vperm.slane %v297_v61, 0 }
 0x33c   :  { %v310_v0 = vadd.f32 %v309_v63, %v308_v62 }
 0x33e   :  { %vm311_vm8 = vcmp.ge.f32.partialorder %v310_v0, 0.0  ;;  %v312_v1 = vmul.f32 0.2, %v310_v0 }
 0x340   :  { %v313_v3 = vsel %vm311_vm8, %v310_v0, %v312_v1 }
 0x341   :  { %v430_v4 = vpop.f32.mrf.mxu1  ;;  %v314_v5 = vadd.f32 %v313_v3, %v893_v15 }
 0x342   :  { %v442_v6 = vperm.slane %v430_v4, 0 }
 0x343   :  { %v315_v7 = vsel %vm181_vm3, %v314_v5, -inf }
 0x344   :  { %v443_v8 = vadd.f32 %v442_v6, %v441_v2  ;;  %316 = vmax.xlane.f32.xlu0 %v315_v7 }
 0x346   :  { %vm444_vm9 = vcmp.ge.f32.partialorder %v443_v8, 0.0  ;;  %v445_v9 = vmul.f32 0.2, %v443_v8 }
 0x348   :  { %v446_v10 = vsel %vm444_vm9, %v443_v8, %v445_v9  ;;  %vm641_vm9 = vcmask 523264  }
 0x349   :  { %v563_v11 = vpop.f32.mrf.mxu1  ;;  %v447_v13 = vadd.f32 %v446_v10, %v893_v15 }
 0x34a   :  { %v575_v14 = vperm.slane %v563_v11, 0 }
 0x34b   :  { %v448_v16 = vsel %vm181_vm3, %v447_v13, -inf }
 0x34c   :  { %v576_v17 = vadd.f32 %v575_v14, %v574_v12  ;;  %449 = vmax.xlane.f32.xlu1 %v448_v16 }
 0x34e   :  { %vm577_vm10 = vcmp.ge.f32.partialorder %v576_v17, 0.0  ;;  %v578_v18 = vmul.f32 0.2, %v576_v17 }
 0x350   :  { %v579_v19 = vsel %vm577_vm10, %v576_v17, %v578_v18  ;;  %vm643_vm10 = vcmask 785408  }
 0x351   :  { %v580_v20 = vadd.f32 %v579_v19, %v893_v15 }
 0x353   :  { %v581_v21 = vsel %vm181_vm3, %v580_v20, -inf }
 0x354   :  { %582 = vmax.xlane.f32.xlu2 %v581_v21 }
 0x3b7   :  { %v317_v22 = vpop.xlane.xlu0 %316 }
 0x3b8   :  { %v318_v23 = vsub.f32 %v314_v5, %v317_v22 }
 0x3ba   :  { %v319_v24 = vmul.f32 1.442695, %v318_v23 }
 0x3bc   :  { %699 = vpow2.f32 %v319_v24 }
 0x3bf   :  { %v450_v25 = vpop.xlane.xlu1 %449 }
 0x3c0   :  { %v451_v26 = vsub.f32 %v447_v13, %v450_v25  ;;  %v694_v13 = vld [vmem:[#allocation7] ss:$0 sm:$0xff] }
 0x3c2   :  { %v700_v27 = vpop.eup %699  ;;  %v452_v28 = vmul.f32 1.442695, %v451_v26 }
 0x3c3   :  { %v321_v29 = vsel %vm181_vm3, %v700_v27, 0.0 }
 0x3c4   :  { %701 = vpow2.f32 %v452_v28  ;;  %322 = vadd.xlane.f32.xlu0 %v321_v29 }
 0x3c7   :  { %v583_v30 = vpop.xlane.xlu2 %582 }
 0x3c8   :  { %v584_v31 = vsub.f32 %v580_v20, %v583_v30 }
 0x3ca   :  { %v702_v32 = vpop.eup %701  ;;  %v585_v33 = vmul.f32 1.442695, %v584_v31 }
 0x3cb   :  { %v454_v15 = vsel %vm181_vm3, %v702_v32, 0.0 }
 0x3cc   :  { %703 = vpow2.f32 %v585_v33  ;;  %455 = vadd.xlane.f32.xlu1 %v454_v15 }
 0x3d2   :  { %v704_v34 = vpop.eup %703 }
 0x3d3   :  { %v587_v35 = vsel %vm181_vm3, %v704_v34, 0.0 }
 0x3d4   :  { %588 = vadd.xlane.f32.xlu2 %v587_v35 }
 0x437   :  { %v323_v36 = vpop.xlane.xlu0 %322 }
 0x438   :  { %705 = vrcp.f32 %v323_v36  ;;  %v335_v42 = vand.u32 2147483648, %v323_v36  ;;  %v333_v43 = vand.u32 2147483647, %v323_v36  ;;  %vm329_vm12 = vweird.f32 %v323_v36 }
 0x43a   :  { %v336_v46 = vor.u32 1.1754944e-38, %v335_v42  ;;  %vm334_vm14 = vcmp.eq.f32.partialorder %v333_v43, 8.507059e+37 }
 0x43e   :  { %v706_v37 = vpop.eup %705 }
 0x43f   :  { %v325_v38 = vmul.f32 %v706_v37, %v323_v36  ;;  %v456_v39 = vpop.xlane.xlu1 %455  ;;  %vm330_vm11 = vweird.f32 %v706_v37 }
 0x440   :  { %707 = vrcp.f32 %v456_v39  ;;  %vm331_vm13 = vmor %vm329_vm12, %vm330_vm11  ;;  %v468_v53 = vand.u32 2147483648, %v456_v39  ;;  %v466_v56 = vand.u32 2147483647, %v456_v39  ;;  %vm462_vm0 = vweird.f32 %v456_v39 }
 0x441   :  { %v326_v40 = vsub.f32 1.0, %v325_v38 }
 0x442   :  { %v469_v60 = vor.u32 1.1754944e-38, %v468_v53  ;;  %vm467_vm4 = vcmp.eq.f32.partialorder %v466_v56, 8.507059e+37 }
 0x443   :  { %v327_v41 = vmul.f32 %v706_v37, %v326_v40 }
 0x445   :  { %v328_v44 = vadd.f32 %v706_v37, %v327_v41 }
 0x446   :  { %v708_v45 = vpop.eup %707 }
 0x447   :  { %v458_v47 = vmul.f32 %v708_v45, %v456_v39  ;;  %v589_v48 = vpop.xlane.xlu2 %588  ;;  %v332_v49 = vsel %vm331_vm13, %v706_v37, %v328_v44  ;;  %vm463_vm15 = vweird.f32 %v708_v45 }
 0x448   :  { %709 = vrcp.f32 %v589_v48  ;;  %v337_v52 = vsel %vm334_vm14, %v336_v46, %v332_v49  ;;  %vm464_vm2 = vmor %vm462_vm0, %vm463_vm15  ;;  %v601_v2 = vand.u32 2147483648, %v589_v48  ;;  %v599_v4 = vand.u32 2147483647, %v589_v48 }
 0x449   :  { %v459_v50 = vsub.f32 1.0, %v458_v47  ;;  %v338_v54 = vmul.f32 %v700_v27, %v337_v52  ;;  %vm595_vm6 = vweird.f32 %v589_v48 }
 0x44a   :  { %v602_v6 = vor.u32 1.1754944e-38, %v601_v2  ;;  %vm600_vm8 = vcmp.eq.f32.partialorder %v599_v4, 8.507059e+37 }
 0x44b   :  { %v460_v55 = vmul.f32 %v708_v45, %v459_v50  ;;  %668 = vmatmul.msk.f32.vlgmr.msrb.gmra.mxu2 %vm181_vm3, %v338_v54 }
 0x44c   :  { %623 = vmatpush.msrb.mxu2 %v917_v59 }
 0x44d   :  { %v461_v57 = vadd.f32 %v708_v45, %v460_v55 }
 0x44e   :  { %v710_v58 = vpop.eup %709 }
 0x44f   :  { %v465_v61 = vsel %vm464_vm2, %v708_v45, %v461_v57  ;;  %v591_v62 = vmul.f32 %v710_v58, %v589_v48  ;;  %vm596_vm5 = vweird.f32 %v710_v58 }
 0x450   :  { %v470_v63 = vsel %vm467_vm4, %v469_v60, %v465_v61  ;;  %vm597_vm7 = vmor %vm595_vm6, %vm596_vm5 }
 0x451   :  { %v592_v0 = vsub.f32 1.0, %v591_v62  ;;  %v471_v1 = vmul.f32 %v702_v32, %v470_v63 }
 0x453   :  { %v593_v3 = vmul.f32 %v710_v58, %v592_v0  ;;  %673 = vmatmul.msk.f32.vlgmr.msra.gmra.mxu2 %vm181_vm3, %v471_v1 }
 0x455   :  { %v594_v5 = vadd.f32 %v710_v58, %v593_v3 }
 0x457   :  { %v598_v59 = vsel %vm597_vm7, %v710_v58, %v594_v5 }
 0x458   :  { %v603_v7 = vsel %vm600_vm8, %v602_v6, %v598_v59 }
 0x459   :  { %v604_v8 = vmul.f32 %v704_v34, %v603_v7 }
 0x45b   :  { %678 = vmatmul.msk.f32.vlgmr.msrb.gmra.mxu2 %vm181_vm3, %v604_v8 }
 0x4ce   :  { %v359_v9 = vpop.f32.mrf.mxu2 }
 0x4cf   :  { %629 = vrot.lane.b32.xlu0 %v359_v9, %s821_s6 }
 0x4d6   :  { %v492_v10 = vpop.f32.mrf.mxu2 }
 0x4d7   :  { %633 = vrot.lane.b32.xlu1 %v492_v10, %s822_s25 }
 0x4de   :  { %v625_v11 = vpop.f32.mrf.mxu2 }
 0x4df   :  { %637 = vrot.lane.b32.xlu2 %v625_v11, %s823_s26 }
 0x539   :  { %v638_v17 = vpop.permute.xlu2 %637 }
 0x541   :  { %v630_v12 = vpop.permute.xlu0 %629 }
 0x542   :  { %v640_v14 = vsel %vm140_vm1, %v910_v51, %v630_v12 }
 0x549   :  { %v634_v16 = vpop.permute.xlu1 %633 }
 0x54a   :  { %v642_v18 = vsel %vm641_vm9, %v640_v14, %v634_v16 }
 0x54b   :  { %v644_v19 = vsel %vm643_vm10, %v642_v18, %v638_v17 }
 0x54c   :  { %v649_v20 = vadd.f32 %v694_v13, %v644_v19 }
 0x54e   :  { %v650_v21 = vmax.f32 %v649_v20, 0.0 }
 0x550   :  { %651 = vst [vmem:[%s947_s7] sm:$0xff] %v650_v21 }
 0x551   :  { %656 = vsyncpa [#allocation3], 1 }
 0x552   :  { %657 = vsyncpa [#allocation5], 1 }
 0x553   :  { %658 = vsyncpa [#allocation8], 1 }

// kernel: multigat_forward.3
= control target key start
LH: loop header
LB: loop body
LE: loop exit
PB: predicated region body
PF: predicated region fallthrough
CT: control target
= control target key end

     0   :  { %s1173_s0 = inlined_call_operand.vmem [shape: f32[8,128], index: 0, kind: input, shape index: {}, may-alias: {0,1}]   ;;  %s1174_s1 = inlined_call_operand.vmem [shape: f32[8,128], index: 1, kind: input, shape index: {}, may-alias: {0,1}]   ;;  %s1175_s2 = inlined_call_operand.vmem [shape: f32[8,16], index: 2, kind: input, shape index: {}]   ;;  %s1176_s3 = inlined_call_operand.vmem [shape: f32[4,128,32], index: 3, kind: input, shape index: {}]   ;;  %s1177_s4 = inlined_call_operand.vmem [shape: f32[4,1,32], index: 4, kind: input, shape index: {}]   ;;  %s1178_s5 = inlined_call_operand.vmem [shape: f32[4,1,32], index: 5, kind: input, shape index: {}]   ;;  %s1179_s6 = inlined_call_operand.vmem [shape: f32[1,128], index: 6, kind: input, shape index: {}]   ;;  %s1180_s7 = inlined_call_operand.vmem [shape: f32[16,128], index: 7, kind: input, shape index: {}]   ;;  %s1181_s8 = inlined_call_operand.vmem [shape: f32[1,128], index: 8, kind: input, shape index: {}]   ;;  %s1182_s9 = inlined_call_operand.vmem [shape: f32[8,8], index: 9, kind: input, shape index: {}]   ;;  %s1183_s10 = inlined_call_operand.hbm [shape: f32[8,128], index: 10, kind: output, shape index: {}]  }
   0x1   :  { %v54_v0 = vld [vmem:[%s1176_s3 + $0x78] sm:$0xff]  ;;  %v53_v1 = vld [vmem:[%s1176_s3 + $0x70] sm:$0xff]  ;;  %v52_v2 = vld [vmem:[%s1176_s3 + $0x68] sm:$0xff] }
   0x2   :  { %55 = vmatpush.msra.mxu0 %v54_v0  ;;  %75 = vmatpush.msra.mxu1 %v54_v0  ;;  %v51_v3 = vld [vmem:[%s1176_s3 + $0x60] sm:$0xff]  ;;  %v50_v4 = vld [vmem:[%s1176_s3 + $0x58] sm:$0xff]  ;;  %v49_v5 = vld [vmem:[%s1176_s3 + $0x50] sm:$0xff] }
   0x4   :  { %56 = vmatpush.msra.mxu0 %v53_v1  ;;  %76 = vmatpush.msra.mxu1 %v53_v1 }
   0x6   :  { %57 = vmatpush.msra.mxu0 %v52_v2  ;;  %77 = vmatpush.msra.mxu1 %v52_v2 }
   0x8   :  { %58 = vmatpush.msra.mxu0 %v51_v3  ;;  %78 = vmatpush.msra.mxu1 %v51_v3 }
   0x9   :  { %15 = vsyncpa [#allocation3], 0  ;;  %v48_v6 = vld [vmem:[%s1176_s3 + $0x48] sm:$0xff]  ;;  %v47_v7 = vld [vmem:[%s1176_s3 + $0x40] sm:$0xff]  ;;  %vm96_vm0 = vcmask 261120   ;;  %vm137_vm2 = vcmask 64512  }
   0xa   :  { %59 = vmatpush.msra.mxu0 %v50_v4  ;;  %79 = vmatpush.msra.mxu1 %v50_v4  ;;  %v46_v8 = vld [vmem:[%s1176_s3 + $0x38] sm:$0xff]  ;;  %v45_v9 = vld [vmem:[%s1176_s3 + $0x30] sm:$0xff]  ;;  %v44_v10 = vld [vmem:[%s1176_s3 + $0x28] sm:$0xff]  ;;  %s817_s27 = smov 32   ;;  %s820_s14 = smov [#allocation2]  }
   0xb   :  { %v43_v11 = vld [vmem:[%s1176_s3 + $0x20] sm:$0xff]  ;;  %v42_v12 = vld [vmem:[%s1176_s3 + $0x18] sm:$0xff]  ;;  %v41_v13 = vld [vmem:[%s1176_s3 + $0x10] sm:$0xff]  ;;  %s687_s15 = sshll.u32 %s820_s14, 4  ;;  %s689_s17 = sshll.u32 %s1183_s10, 4  ;;  %s688_s15 = int_to_ptr.vmem [resolvable:$true] %s687_s15  ;;  %s690_s17 = int_to_ptr.hbm [resolvable:$true] %s689_s17 }
   0xc   :  { %60 = vmatpush.msra.mxu0 %v49_v5  ;;  %80 = vmatpush.msra.mxu1 %v49_v5  ;;  %v40_v14 = vld [vmem:[%s1176_s3 + $0x8] sm:$0xff]  ;;  %v39_v15 = vld [vmem:[%s1176_s3] sm:$0xff]  ;;  %v716_v33 = vld [vmem:[%s1176_s3 + $0xf8] sm:$0xff] }
   0xd   :  { %v927_v16 = vld [vmem:[%s1173_s0] sm:$0xff]  ;;  %v715_v34 = vld [vmem:[%s1176_s3 + $0xf0] sm:$0xff]  ;;  %v714_v35 = vld [vmem:[%s1176_s3 + $0xe8] sm:$0xff] }
   0xe   :  { %61 = vmatpush.msra.mxu0 %v48_v6  ;;  %81 = vmatpush.msra.mxu1 %v48_v6  ;;  %v932_v17 = vld [vmem:[%s1174_s1] sm:$0xff]  ;;  %v712_v37 = vld [vmem:[%s1176_s3 + $0xd8] sm:$0xff]  ;;  %v711_v38 = vld [vmem:[%s1176_s3 + $0xd0] sm:$0xff] }
   0xf   :  { %v769_v18 = vld [vmem:[%s1178_s5] ss:$0 sm:$0xff]  ;;  %v710_v44 = vld [vmem:[%s1176_s3 + $0xc8] sm:$0xff]  ;;  %v708_v46 = vld [vmem:[%s1176_s3 + $0xb8] sm:$0xff] }
  0x10   :  { %62 = vmatpush.msra.mxu0 %v47_v7  ;;  %82 = vmatpush.msra.mxu1 %v47_v7  ;;  %v95_v21 = vld [vmem:[%s1177_s4] sm:$0x1]  ;;  %v707_v47 = vld [vmem:[%s1176_s3 + $0xb0] sm:$0xff]  ;;  %v706_v48 = vld [vmem:[%s1176_s3 + $0xa8] sm:$0xff] }
  0x11   :  { %v948_v29 = vld [vmem:[%s1182_s9] sm:$0xff]  ;;  %v704_v50 = vld [vmem:[%s1176_s3 + $0x98] sm:$0xff]  ;;  %v703_v51 = vld [vmem:[%s1176_s3 + $0x90] sm:$0xff] }
  0x12   :  { %63 = vmatpush.msra.mxu0 %v46_v8  ;;  %83 = vmatpush.msra.mxu1 %v46_v8  ;;  %v713_v36 = vld [vmem:[%s1176_s3 + $0xe0] sm:$0xff]  ;;  %v702_v52 = vld [vmem:[%s1176_s3 + $0x88] sm:$0xff]  ;;  %v737_v54 = vld [vmem:[%s1176_s3 + $0x178] sm:$0xff] }
  0x13   :  { %v709_v45 = vld [vmem:[%s1176_s3 + $0xc0] sm:$0xff]  ;;  %v736_v55 = vld [vmem:[%s1176_s3 + $0x170] sm:$0xff]  ;;  %v735_v56 = vld [vmem:[%s1176_s3 + $0x168] sm:$0xff] }
  0x14   :  { %64 = vmatpush.msra.mxu0 %v45_v9  ;;  %84 = vmatpush.msra.mxu1 %v45_v9  ;;  %v705_v49 = vld [vmem:[%s1176_s3 + $0xa0] sm:$0xff]  ;;  %v733_v58 = vld [vmem:[%s1176_s3 + $0x158] sm:$0xff]  ;;  %v732_v59 = vld [vmem:[%s1176_s3 + $0x150] sm:$0xff] }
  0x15   :  { %v701_v53 = vld [vmem:[%s1176_s3 + $0x80] sm:$0xff]  ;;  %v731_v61 = vld [vmem:[%s1176_s3 + $0x148] sm:$0xff]  ;;  %v729_v63 = vld [vmem:[%s1176_s3 + $0x138] sm:$0xff] }
  0x16   :  { %65 = vmatpush.msra.mxu0 %v44_v10  ;;  %85 = vmatpush.msra.mxu1 %v44_v10  ;;  %v734_v57 = vld [vmem:[%s1176_s3 + $0x160] sm:$0xff]  ;;  %v728_v0 = vld [vmem:[%s1176_s3 + $0x130] sm:$0xff]  ;;  %v727_v3 = vld [vmem:[%s1176_s3 + $0x128] sm:$0xff] }
  0x17   :  { %v730_v62 = vld [vmem:[%s1176_s3 + $0x140] sm:$0xff]  ;;  %v725_v9 = vld [vmem:[%s1176_s3 + $0x118] sm:$0xff] }
  0x18   :  { %66 = vmatpush.msra.mxu0 %v43_v11  ;;  %86 = vmatpush.msra.mxu1 %v43_v11  ;;  %v726_v5 = vld [vmem:[%s1176_s3 + $0x120] sm:$0xff]  ;;  %v724_v11 = vld [vmem:[%s1176_s3 + $0x110] sm:$0xff] }
  0x1a   :  { %67 = vmatpush.msra.mxu0 %v42_v12  ;;  %87 = vmatpush.msra.mxu1 %v42_v12 }
  0x1c   :  { %68 = vmatpush.msra.mxu0 %v41_v13  ;;  %88 = vmatpush.msra.mxu1 %v41_v13 }
  0x1e   :  { %69 = vmatpush.msra.mxu0 %v40_v14  ;;  %89 = vmatpush.msra.mxu1 %v40_v14  ;;  %v723_v14 = vld [vmem:[%s1176_s3 + $0x108] sm:$0xff] }
  0x20   :  { %70 = vmatpush.msra.mxu0 %v39_v15  ;;  %90 = vmatpush.msra.mxu1 %v39_v15 }
  0x21   :  { %71 = vmatmul.f32.vlgmr.msra.gmra.mxu0 %v927_v16  ;;  %91 = vmatmul.f32.vlgmr.msra.gmra.mxu1 %v932_v17 }
  0x9e   :  { %v72_v19 = vpop.f32.mrf.mxu0  ;;  %v92_v20 = vpop.f32.mrf.mxu1 }
  0x9f   :  { %698 = vmatpush.xpose.msk.msra.mxu2 %vm96_vm0, %v72_v19  ;;  %180 = vmatpush.msra.mxu3 %v72_v19  ;;  %v127_v22 = vmul.f32 %v769_v18, %v92_v20  ;;  %v722_v19 = vld [vmem:[%s1176_s3 + $0x100] sm:$0xff] }
  0xa1   :  { %v128_v23 = vsel %vm96_vm0, %v127_v22, 0.0  ;;  %202 = vmatpush.msrb.mxu3 %v716_v33 }
  0xa2   :  { %699 = vmatmul.msk.f32.vlgmr.msra.gmra.mxu2 %vm96_vm0, %v95_v21  ;;  %129 = vadd.xlane.f32.xlu0 %v128_v23  ;;  %v770_v21 = vld [vmem:[%s1178_s5 + $0x1] ss:$0 sm:$0xff] }
  0xa3   :  { %222 = vmatpush.msrb.mxu2 %v716_v33  ;;  %203 = vmatpush.msrb.mxu3 %v715_v34  ;;  %v738_v33 = vld [vmem:[%s1177_s4 + $0x2] sm:$0x1] }
  0xa5   :  { %223 = vmatpush.msrb.mxu2 %v715_v34  ;;  %204 = vmatpush.msrb.mxu3 %v714_v35 }
  0xa7   :  { %224 = vmatpush.msrb.mxu2 %v714_v35  ;;  %205 = vmatpush.msrb.mxu3 %v713_v36 }
  0xa9   :  { %225 = vmatpush.msrb.mxu2 %v713_v36  ;;  %206 = vmatpush.msrb.mxu3 %v712_v37 }
  0xab   :  { %226 = vmatpush.msrb.mxu2 %v712_v37  ;;  %207 = vmatpush.msrb.mxu3 %v711_v38 }
  0xad   :  { %227 = vmatpush.msrb.mxu2 %v711_v38  ;;  %208 = vmatpush.msrb.mxu3 %v710_v44 }
  0xaf   :  { %228 = vmatpush.msrb.mxu2 %v710_v44  ;;  %209 = vmatpush.msrb.mxu3 %v709_v45 }
  0xb1   :  { %229 = vmatpush.msrb.mxu2 %v709_v45  ;;  %210 = vmatpush.msrb.mxu3 %v708_v46 }
  0xb3   :  { %230 = vmatpush.msrb.mxu2 %v708_v46  ;;  %211 = vmatpush.msrb.mxu3 %v707_v47 }
  0xb5   :  { %231 = vmatpush.msrb.mxu2 %v707_v47  ;;  %212 = vmatpush.msrb.mxu3 %v706_v48 }
  0xb7   :  { %232 = vmatpush.msrb.mxu2 %v706_v48  ;;  %213 = vmatpush.msrb.mxu3 %v705_v49 }
  0xb9   :  { %233 = vmatpush.msrb.mxu2 %v705_v49  ;;  %214 = vmatpush.msrb.mxu3 %v704_v50 }
  0xbb   :  { %234 = vmatpush.msrb.mxu2 %v704_v50  ;;  %215 = vmatpush.msrb.mxu3 %v703_v51 }
  0xbd   :  { %235 = vmatpush.msrb.mxu2 %v703_v51  ;;  %216 = vmatpush.msrb.mxu3 %v702_v52 }
  0xbf   :  { %236 = vmatpush.msrb.mxu2 %v702_v52  ;;  %217 = vmatpush.msrb.mxu3 %v701_v53 }
  0xc1   :  { %237 = vmatpush.msrb.mxu2 %v701_v53 }
  0xc2   :  { %238 = vmatmul.f32.vlgmr.msrb.gmra.mxu2 %v932_v17 }
  0xc3   :  { %369 = vmatpush.msra.mxu2 %v737_v54 }
  0xc5   :  { %370 = vmatpush.msra.mxu2 %v736_v55 }
  0xc7   :  { %371 = vmatpush.msra.mxu2 %v735_v56 }
  0xc9   :  { %372 = vmatpush.msra.mxu2 %v734_v57 }
  0xcb   :  { %373 = vmatpush.msra.mxu2 %v733_v58 }
  0xcd   :  { %374 = vmatpush.msra.mxu2 %v732_v59 }
  0xcf   :  { %375 = vmatpush.msra.mxu2 %v731_v61 }
  0xd1   :  { %376 = vmatpush.msra.mxu2 %v730_v62 }
  0xd3   :  { %377 = vmatpush.msra.mxu2 %v729_v63 }
  0xd5   :  { %378 = vmatpush.msra.mxu2 %v728_v0 }
  0xd7   :  { %379 = vmatpush.msra.mxu2 %v727_v3 }
  0xd9   :  { %380 = vmatpush.msra.mxu2 %v726_v5 }
  0xdb   :  { %381 = vmatpush.msra.mxu2 %v725_v9 }
  0xdd   :  { %382 = vmatpush.msra.mxu2 %v724_v11 }
  0xdf   :  { %383 = vmatpush.msra.mxu2 %v723_v14 }
  0xe1   :  { %384 = vmatpush.msra.mxu2 %v722_v19 }
  0xe2   :  { %385 = vmatmul.f32.vlgmr.msra.gmra.mxu2 %v932_v17 }
 0x115   :  { %v130_v25 = vpop.xlane.xlu0 %129 }
 0x125   :  { %v120_v24 = vpop.f32.mrf.mxu2 }
 0x126   :  { %v131_v26 = vperm.slane %v120_v24, 0 }
 0x128   :  { %v132_v27 = vadd.f32 %v131_v26, %v130_v25  ;;  %v771_v26 = vld [vmem:[%s1178_s5 + $0x2] ss:$0 sm:$0xff] }
 0x12a   :  { %vm133_vm1 = vcmp.ge.f32.partialorder %v132_v27, 0.0  ;;  %v134_v28 = vmul.f32 0.2, %v132_v27 }
 0x12c   :  { %v135_v30 = vsel %vm133_vm1, %v132_v27, %v134_v28 }
 0x12d   :  { %v136_v31 = vadd.f32 %v135_v30, %v948_v29 }
 0x12f   :  { %v138_v32 = vsel %vm137_vm2, %v136_v31, -inf }
 0x130   :  { %139 = vmax.xlane.f32.xlu0 %v138_v32 }
 0x145   :  { %v239_v20 = vpop.f32.mrf.mxu2 }
 0x146   :  { %v275_v22 = vmul.f32 %v770_v21, %v239_v20 }
 0x148   :  { %v276_v23 = vsel %vm96_vm0, %v275_v22, 0.0 }
 0x165   :  { %v386_v25 = vpop.f32.mrf.mxu2 }
 0x166   :  { %v422_v27 = vmul.f32 %v771_v26, %v386_v25 }
 0x168   :  { %v423_v30 = vsel %vm96_vm0, %v422_v27, 0.0 }
 0x169   :  { %424 = vadd.xlane.f32.xlu2 %v423_v30 }
 0x1a3   :  { %v140_v39 = vpop.xlane.xlu0 %139 }
 0x1a4   :  { %v141_v40 = vsub.f32 %v136_v31, %v140_v39  ;;  %v717_v31 = vld [vmem:[%s1177_s4 + $0x1] sm:$0x1] }
 0x1a6   :  { %v142_v41 = vmul.f32 1.442695, %v141_v40 }
 0x1a8   :  { %775 = vpow2.f32 %v142_v41 }
 0x1ae   :  { %v970_v42 = vpop.eup %775 }
 0x1af   :  { %v144_v43 = vsel %vm137_vm2, %v970_v42, 0.0 }
 0x1b0   :  { %145 = vadd.xlane.f32.xlu1 %v144_v43 }
 0x1b8   :  { %277 = vadd.xlane.f32.xlu1 %v276_v23 }
 0x1dc   :  { %v425_v43 = vpop.xlane.xlu2 %424 }
 0x223   :  { %v146_v60 = vpop.xlane.xlu1 %145 }
 0x224   :  { %777 = vrcp.f32 %v146_v60  ;;  %v158_v6 = vand.u32 2147483648, %v146_v60  ;;  %v156_v8 = vand.u32 2147483647, %v146_v60  ;;  %vm152_vm4 = vweird.f32 %v146_v60 }
 0x226   :  { %v159_v12 = vor.u32 1.1754944e-38, %v158_v6  ;;  %vm157_vm6 = vcmp.eq.f32.partialorder %v156_v8, 8.507059e+37  ;;  %v748_v6 = vld [vmem:[%s1176_s3 + $0x1a8] sm:$0xff]  ;;  %v746_v8 = vld [vmem:[%s1176_s3 + $0x198] sm:$0xff] }
 0x22a   :  { %v778_v1 = vpop.eup %777 }
 0x22b   :  { %v148_v2 = vmul.f32 %v778_v1, %v146_v60  ;;  %vm153_vm3 = vweird.f32 %v778_v1  ;;  %v278_v35 = vpop.xlane.xlu1 %277  ;;  %v758_v60 = vld [vmem:[%s1176_s3 + $0x1f8] sm:$0xff] }
 0x22c   :  { %vm154_vm5 = vmor %vm152_vm4, %vm153_vm3  ;;  %vm650_vm4 = vcmask 130048  }
 0x22d   :  { %v149_v4 = vsub.f32 1.0, %v148_v2  ;;  %v752_v2 = vld [vmem:[%s1176_s3 + $0x1c8] sm:$0xff] }
 0x22f   :  { %v150_v7 = vmul.f32 %v778_v1, %v149_v4  ;;  %v750_v4 = vld [vmem:[%s1176_s3 + $0x1b8] sm:$0xff] }
 0x231   :  { %v151_v10 = vadd.f32 %v778_v1, %v150_v7  ;;  %v747_v7 = vld [vmem:[%s1176_s3 + $0x1a0] sm:$0xff] }
 0x233   :  { %v155_v13 = vsel %vm154_vm5, %v778_v1, %v151_v10  ;;  %v753_v1 = vld [vmem:[%s1176_s3 + $0x1d0] sm:$0xff]  ;;  %v744_v10 = vld [vmem:[%s1176_s3 + $0x188] sm:$0xff] }
 0x234   :  { %v160_v15 = vsel %vm157_vm6, %v159_v12, %v155_v13  ;;  %v743_v12 = vld [vmem:[%s1176_s3 + $0x180] sm:$0xff] }
 0x235   :  { %v161_v18 = vmul.f32 %v970_v42, %v160_v15 }
 0x237   :  { %700 = vmatmul.msk.f32.vlgmr.msra.gmra.mxu3 %vm137_vm2, %v161_v18 }
 0x238   :  { %349 = vmatpush.msra.mxu3 %v737_v54 }
 0x23a   :  { %350 = vmatpush.msra.mxu3 %v736_v55 }
 0x23c   :  { %351 = vmatpush.msra.mxu3 %v735_v56 }
 0x23e   :  { %352 = vmatpush.msra.mxu3 %v734_v57 }
 0x23f   :  { %218 = vmatmul.f32.vlgmr.msrb.gmra.mxu3 %v927_v16 }
 0x240   :  { %353 = vmatpush.msra.mxu3 %v733_v58 }
 0x242   :  { %354 = vmatpush.msra.mxu3 %v732_v59 }
 0x244   :  { %355 = vmatpush.msra.mxu3 %v731_v61  ;;  %v757_v61 = vld [vmem:[%s1176_s3 + $0x1f0] sm:$0xff] }
 0x246   :  { %356 = vmatpush.msra.mxu3 %v730_v62  ;;  %v756_v62 = vld [vmem:[%s1176_s3 + $0x1e8] sm:$0xff] }
 0x248   :  { %357 = vmatpush.msra.mxu3 %v729_v63  ;;  %v755_v63 = vld [vmem:[%s1176_s3 + $0x1e0] sm:$0xff] }
 0x24a   :  { %358 = vmatpush.msra.mxu3 %v728_v0  ;;  %v754_v0 = vld [vmem:[%s1176_s3 + $0x1d8] sm:$0xff] }
 0x24c   :  { %359 = vmatpush.msra.mxu3 %v727_v3  ;;  %v751_v3 = vld [vmem:[%s1176_s3 + $0x1c0] sm:$0xff] }
 0x24e   :  { %360 = vmatpush.msra.mxu3 %v726_v5  ;;  %v749_v5 = vld [vmem:[%s1176_s3 + $0x1b0] sm:$0xff] }
 0x250   :  { %361 = vmatpush.msra.mxu3 %v725_v9  ;;  %v745_v9 = vld [vmem:[%s1176_s3 + $0x190] sm:$0xff] }
 0x252   :  { %362 = vmatpush.msra.mxu3 %v724_v11 }
 0x254   :  { %363 = vmatpush.msra.mxu3 %v723_v14 }
 0x256   :  { %364 = vmatpush.msra.mxu3 %v722_v19 }
 0x257   :  { %365 = vmatmul.f32.vlgmr.msra.gmra.mxu3 %v927_v16 }
 0x2ba   :  { %v1062_v24 = vpop.f32.mrf.mxu3 }
 0x2c2   :  { %v219_v28 = vpop.f32.mrf.mxu3 }
 0x2c3   :  { %718 = vmatpush.xpose.msk.msrb.mxu0 %vm96_vm0, %v219_v28  ;;  %327 = vmatpush.msrb.mxu1 %v219_v28 }
 0x2c6   :  { %719 = vmatmul.msk.f32.vlgmr.msrb.gmra.mxu0 %vm96_vm0, %v717_v31 }
 0x2da   :  { %v366_v32 = vpop.f32.mrf.mxu3 }
 0x2db   :  { %739 = vmatpush.xpose.msk.msra.mxu0 %vm96_vm0, %v366_v32  ;;  %474 = vmatpush.msra.mxu1 %v366_v32 }
 0x2de   :  { %740 = vmatmul.msk.f32.vlgmr.msra.gmra.mxu0 %vm96_vm0, %v738_v33 }
 0x2df   :  { %496 = vmatpush.msrb.mxu0 %v758_v60 }
 0x2e1   :  { %497 = vmatpush.msrb.mxu0 %v757_v61 }
 0x2e3   :  { %498 = vmatpush.msrb.mxu0 %v756_v62 }
 0x2e5   :  { %499 = vmatpush.msrb.mxu0 %v755_v63 }
 0x2e7   :  { %500 = vmatpush.msrb.mxu0 %v754_v0 }
 0x2e9   :  { %501 = vmatpush.msrb.mxu0 %v753_v1 }
 0x2eb   :  { %502 = vmatpush.msrb.mxu0 %v752_v2 }
 0x2ed   :  { %503 = vmatpush.msrb.mxu0 %v751_v3 }
 0x2ef   :  { %504 = vmatpush.msrb.mxu0 %v750_v4 }
 0x2f1   :  { %505 = vmatpush.msrb.mxu0 %v749_v5 }
 0x2f3   :  { %506 = vmatpush.msrb.mxu0 %v748_v6 }
 0x2f5   :  { %507 = vmatpush.msrb.mxu0 %v747_v7 }
 0x2f7   :  { %508 = vmatpush.msrb.mxu0 %v746_v8 }
 0x2f9   :  { %509 = vmatpush.msrb.mxu0 %v745_v9 }
 0x2fb   :  { %510 = vmatpush.msrb.mxu0 %v744_v10 }
 0x2fd   :  { %511 = vmatpush.msrb.mxu0 %v743_v12 }
 0x2fe   :  { %512 = vmatmul.f32.vlgmr.msrb.gmra.mxu0 %v927_v16 }
 0x343   :  { %v267_v34 = vpop.f32.mrf.mxu0 }
 0x344   :  { %v279_v36 = vperm.slane %v267_v34, 0 }
 0x346   :  { %v280_v37 = vadd.f32 %v279_v36, %v278_v35 }
 0x348   :  { %vm281_vm7 = vcmp.ge.f32.partialorder %v280_v37, 0.0  ;;  %v282_v38 = vmul.f32 0.2, %v280_v37 }
 0x34a   :  { %v283_v39 = vsel %vm281_vm7, %v280_v37, %v282_v38 }
 0x34b   :  { %v284_v40 = vadd.f32 %v283_v39, %v948_v29 }
 0x34d   :  { %v285_v41 = vsel %vm137_vm2, %v284_v40, -inf }
 0x34e   :  { %286 = vmax.xlane.f32.xlu2 %v285_v41 }
 0x35b   :  { %v414_v42 = vpop.f32.mrf.mxu0 }
 0x35c   :  { %v426_v44 = vperm.slane %v414_v42, 0 }
 0x35e   :  { %v427_v45 = vadd.f32 %v426_v44, %v425_v43  ;;  %v772_v43 = vld [vmem:[%s1178_s5 + $0x3] ss:$0 sm:$0xff] }
 0x360   :  { %vm428_vm8 = vcmp.ge.f32.partialorder %v427_v45, 0.0  ;;  %v429_v46 = vmul.f32 0.2, %v427_v45 }
 0x362   :  { %v430_v47 = vsel %vm428_vm8, %v427_v45, %v429_v46 }
 0x363   :  { %v431_v48 = vadd.f32 %v430_v47, %v948_v29 }
 0x365   :  { %v432_v49 = vsel %vm137_vm2, %v431_v48, -inf }
 0x366   :  { %433 = vmax.xlane.f32.xlu0 %v432_v49 }
 0x37b   :  { %v513_v39 = vpop.f32.mrf.mxu0 }
 0x37c   :  { %760 = vmatpush.xpose.msk.msrb.mxu3 %vm96_vm0, %v513_v39  ;;  %621 = vmatpush.msrb.mxu2 %v513_v39 }
 0x3c1   :  { %v287_v50 = vpop.xlane.xlu2 %286 }
 0x3c2   :  { %v288_v51 = vsub.f32 %v284_v40, %v287_v50  ;;  %v759_v40 = vld [vmem:[%s1177_s4 + $0x3] sm:$0x1]  ;;  %s818_s4 = smov 64  }
 0x3c3   :  { %761 = vmatmul.msk.f32.vlgmr.msrb.gmra.mxu3 %vm96_vm0, %v759_v40 }
 0x3c4   :  { %v289_v52 = vmul.f32 1.442695, %v288_v51 }
 0x3c6   :  { %779 = vpow2.f32 %v289_v52 }
 0x3cc   :  { %v780_v53 = vpop.eup %779 }
 0x3cd   :  { %v291_v54 = vsel %vm137_vm2, %v780_v53, 0.0 }
 0x3ce   :  { %292 = vadd.xlane.f32.xlu1 %v291_v54 }
 0x3d9   :  { %v434_v55 = vpop.xlane.xlu0 %433 }
 0x3da   :  { %v435_v56 = vsub.f32 %v431_v48, %v434_v55 }
 0x3dc   :  { %v436_v57 = vmul.f32 1.442695, %v435_v56 }
 0x3de   :  { %781 = vpow2.f32 %v436_v57 }
 0x3e4   :  { %v1083_v58 = vpop.eup %781 }
 0x3e5   :  { %v438_v59 = vsel %vm137_vm2, %v1083_v58, 0.0 }
 0x3e6   :  { %439 = vadd.xlane.f32.xlu2 %v438_v59  ;;  %v645_v59 = vld [vmem:[%s1180_s7 + $0x8] sm:$0xff] }
 0x3e7   :  { %668 = vmatpush.msra.mxu3 %v645_v59 }
 0x441   :  { %v293_v11 = vpop.xlane.xlu1 %292 }
 0x442   :  { %783 = vrcp.f32 %v293_v11  ;;  %v305_v18 = vand.u32 2147483648, %v293_v11  ;;  %v303_v20 = vand.u32 2147483647, %v293_v11  ;;  %vm299_vm10 = vweird.f32 %v293_v11 }
 0x444   :  { %v306_v22 = vor.u32 1.1754944e-38, %v305_v18  ;;  %vm304_vm12 = vcmp.eq.f32.partialorder %v303_v20, 8.507059e+37 }
 0x446   :  { %v561_v46 = vpop.f32.mrf.mxu3 }
 0x447   :  { %v573_v47 = vperm.slane %v561_v46, 0 }
 0x448   :  { %v784_v13 = vpop.eup %783 }
 0x449   :  { %v295_v14 = vmul.f32 %v784_v13, %v293_v11  ;;  %vm300_vm9 = vweird.f32 %v784_v13  ;;  %v774_v11 = vld [vmem:[%s1181_s8] ss:$0 sm:$0xff] }
 0x44a   :  { %vm301_vm11 = vmor %vm299_vm10, %vm300_vm9  ;;  %vm639_vm9 = vcmask 523264   ;;  %vm641_vm10 = vcmask 785408  }
 0x44b   :  { %v296_v15 = vsub.f32 1.0, %v295_v14  ;;  %v773_v14 = vld [vmem:[%s1179_s6] ss:$0 sm:$0xff] }
 0x44d   :  { %v297_v19 = vmul.f32 %v784_v13, %v296_v15 }
 0x44f   :  { %v298_v21 = vadd.f32 %v784_v13, %v297_v19 }
 0x451   :  { %v302_v23 = vsel %vm301_vm11, %v784_v13, %v298_v21 }
 0x452   :  { %v307_v25 = vsel %vm304_vm12, %v306_v22, %v302_v23 }
 0x453   :  { %v308_v26 = vmul.f32 %v780_v53, %v307_v25 }
 0x455   :  { %721 = vmatmul.msk.f32.vlgmr.msrb.gmra.mxu1 %vm137_vm2, %v308_v26 }
 0x456   :  { %516 = vmatpush.msrb.mxu1 %v758_v60  ;;  %v643_v60 = vld [vmem:[%s1175_s2] sm:$0xff]  ;;  %s819_s2 = smov 96  }
 0x458   :  { %517 = vmatpush.msrb.mxu1 %v757_v61 }
 0x459   :  { %v440_v16 = vpop.xlane.xlu2 %439 }
 0x45a   :  { %785 = vrcp.f32 %v440_v16  ;;  %518 = vmatpush.msrb.mxu1 %v756_v62  ;;  %v452_v31 = vand.u32 2147483648, %v440_v16  ;;  %v450_v33 = vand.u32 2147483647, %v440_v16  ;;  %vm446_vm14 = vweird.f32 %v440_v16 }
 0x45c   :  { %519 = vmatpush.msrb.mxu1 %v755_v63  ;;  %v453_v35 = vor.u32 1.1754944e-38, %v452_v31  ;;  %vm451_vm1 = vcmp.eq.f32.partialorder %v450_v33, 8.507059e+37 }
 0x45e   :  { %520 = vmatpush.msrb.mxu1 %v754_v0 }
 0x460   :  { %v786_v27 = vpop.eup %785  ;;  %521 = vmatpush.msrb.mxu1 %v753_v1 }
 0x461   :  { %v442_v28 = vmul.f32 %v786_v27, %v440_v16  ;;  %vm447_vm13 = vweird.f32 %v786_v27 }
 0x462   :  { %522 = vmatpush.msrb.mxu1 %v752_v2  ;;  %vm448_vm15 = vmor %vm446_vm14, %vm447_vm13 }
 0x463   :  { %v443_v30 = vsub.f32 1.0, %v442_v28 }
 0x464   :  { %523 = vmatpush.msrb.mxu1 %v751_v3 }
 0x465   :  { %v444_v32 = vmul.f32 %v786_v27, %v443_v30 }
 0x466   :  { %524 = vmatpush.msrb.mxu1 %v750_v4 }
 0x467   :  { %v445_v34 = vadd.f32 %v786_v27, %v444_v32 }
 0x468   :  { %525 = vmatpush.msrb.mxu1 %v749_v5 }
 0x469   :  { %v449_v36 = vsel %vm448_vm15, %v786_v27, %v445_v34 }
 0x46a   :  { %v454_v37 = vsel %vm451_vm1, %v453_v35, %v449_v36  ;;  %526 = vmatpush.msrb.mxu1 %v748_v6 }
 0x46b   :  { %v455_v38 = vmul.f32 %v1083_v58, %v454_v37 }
 0x46c   :  { %527 = vmatpush.msrb.mxu1 %v747_v7 }
 0x46d   :  { %742 = vmatmul.msk.f32.vlgmr.msra.gmra.mxu1 %vm137_vm2, %v455_v38 }
 0x46e   :  { %528 = vmatpush.msrb.mxu1 %v746_v8 }
 0x470   :  { %529 = vmatpush.msrb.mxu1 %v745_v9 }
 0x472   :  { %530 = vmatpush.msrb.mxu1 %v744_v10 }
 0x474   :  { %531 = vmatpush.msrb.mxu1 %v743_v12 }
 0x475   :  { %532 = vmatmul.f32.vlgmr.msrb.gmra.mxu1 %v932_v17 }
 0x4d2   :  { %v329_v41 = vpop.f32.mrf.mxu1 }
 0x4ea   :  { %v476_v42 = vpop.f32.mrf.mxu1 }
 0x4f2   :  { %v533_v44 = vpop.f32.mrf.mxu1 }
 0x4f3   :  { %v569_v45 = vmul.f32 %v772_v43, %v533_v44 }
 0x4f5   :  { %v570_v17 = vsel %vm96_vm0, %v569_v45, 0.0 }
 0x4f6   :  { %571 = vadd.xlane.f32.xlu0 %v570_v17 }
 0x50a   :  { %627 = vrot.lane.b32.xlu0 %v329_v41, %s817_s27 }
 0x569   :  { %v572_v48 = vpop.xlane.xlu0 %571 }
 0x56a   :  { %v574_v49 = vadd.f32 %v573_v47, %v572_v48 }
 0x56c   :  { %vm575_vm3 = vcmp.ge.f32.partialorder %v574_v49, 0.0  ;;  %v576_v50 = vmul.f32 0.2, %v574_v49 }
 0x56e   :  { %v577_v51 = vsel %vm575_vm3, %v574_v49, %v576_v50 }
 0x56f   :  { %v578_v52 = vadd.f32 %v577_v51, %v948_v29  ;;  %v644_v29 = vld [vmem:[%s1180_s7] sm:$0xff] }
 0x570   :  { %669 = vmatpush.msra.mxu3 %v644_v29 }
 0x571   :  { %v579_v53 = vsel %vm137_vm2, %v578_v52, -inf  ;;  %764 = vmatmul.msk.f32.vlgmr.msra.gmra.mxu3 %vm650_vm4, %v643_v60 }
 0x572   :  { %580 = vmax.xlane.f32.xlu1 %v579_v53 }
 0x57c   :  { %v628_v10 = vpop.permute.xlu0 %627 }
 0x57d   :  { %v638_v15 = vsel %vm96_vm0, %v1062_v24, %v628_v10 }
 0x58b   :  { %631 = vrot.lane.b32.xlu1 %v476_v42, %s818_s4 }
 0x5e5   :  { %v581_v54 = vpop.xlane.xlu1 %580 }
 0x5e6   :  { %v582_v55 = vsub.f32 %v578_v52, %v581_v54 }
 0x5e8   :  { %v583_v56 = vmul.f32 1.442695, %v582_v55 }
 0x5ea   :  { %787 = vpow2.f32 %v583_v56 }
 0x5f0   :  { %v788_v57 = vpop.eup %787 }
 0x5f1   :  { %v585_v58 = vsel %vm137_vm2, %v788_v57, 0.0 }
 0x5f2   :  { %586 = vadd.xlane.f32.xlu2 %v585_v58 }
 0x5f4   :  { %v671_v13 = vpop.f32.mrf.mxu3 }
 0x5f5   :  { %v672_v20 = vadd.f32 %v774_v11, %v671_v13 }
 0x5fd   :  { %v632_v12 = vpop.permute.xlu1 %631 }
 0x5fe   :  { %v640_v18 = vsel %vm639_vm9, %v638_v15, %v632_v12 }
 0x665   :  { %v587_v61 = vpop.xlane.xlu2 %586 }
 0x666   :  { %789 = vrcp.f32 %v587_v61  ;;  %v599_v1 = vand.u32 2147483648, %v587_v61  ;;  %v597_v3 = vand.u32 2147483647, %v587_v61  ;;  %vm593_vm6 = vweird.f32 %v587_v61 }
 0x668   :  { %v600_v5 = vor.u32 1.1754944e-38, %v599_v1  ;;  %vm598_vm8 = vcmp.eq.f32.partialorder %v597_v3, 8.507059e+37 }
 0x66c   :  { %v790_v62 = vpop.eup %789 }
 0x66d   :  { %v589_v63 = vmul.f32 %v790_v62, %v587_v61  ;;  %vm594_vm5 = vweird.f32 %v790_v62 }
 0x66e   :  { %vm595_vm7 = vmor %vm593_vm6, %vm594_vm5 }
 0x66f   :  { %v590_v0 = vsub.f32 1.0, %v589_v63 }
 0x671   :  { %v591_v2 = vmul.f32 %v790_v62, %v590_v0 }
 0x673   :  { %v592_v4 = vadd.f32 %v790_v62, %v591_v2 }
 0x675   :  { %v596_v6 = vsel %vm595_vm7, %v790_v62, %v592_v4 }
 0x676   :  { %v601_v7 = vsel %vm598_vm8, %v600_v5, %v596_v6 }
 0x677   :  { %v602_v8 = vmul.f32 %v788_v57, %v601_v7 }
 0x679   :  { %763 = vmatmul.msk.f32.vlgmr.msrb.gmra.mxu2 %vm137_vm2, %v602_v8 }
 0x6fc   :  { %v623_v9 = vpop.f32.mrf.mxu2 }
 0x6fd   :  { %635 = vrot.lane.b32.xlu2 %v623_v9, %s819_s2 }
 0x757   :  { %v636_v19 = vpop.permute.xlu2 %635 }
 0x758   :  { %v642_v21 = vsel %vm641_vm10, %v640_v18, %v636_v19 }
 0x759   :  { %v678_v22 = vadd.f32 %v773_v14, %v642_v21 }
 0x75b   :  { %v679_v23 = vadd.f32 %v678_v22, %v672_v20 }
 0x75d   :  { %v680_v25 = vmax.f32 %v679_v23, 0.0 }
 0x75f   :  { %681 = vst [vmem:[#allocation2] sm:$0xff] %v680_v25 }
 0x760   :  { %692 = dma.vmem_to_hbm [thread:$0]  %s688_s15, 128, %s690_s17, [#allocation3]  }
 0x761   :  { %815 = dma.done.wait [#allocation3], 128  }
 0x762   :  { %816 = vsyncadd [#allocation3], 4294967168 }
 0x763   :  { %697 = vsyncpa [#allocation3], 1 }

</bundles_post_ra>
